<compile_context>
chip_gen: v6e
topology: v6e:2x2x1
jax: 0.10.0
libtpu: 0.0.40
codegen_flags: <defaults>
</compile_context>

<pallas_src>
import functools
import math

import jax
import jax.numpy as jnp
from jax.experimental import pallas as pl
from jax.experimental.pallas import tpu as pltpu


# ---------------------------------------------------------------------------
# Pallas kernel: banded one-hot gather matmul
# ---------------------------------------------------------------------------
def _onehot_gather_kernel(flat_ref, x_ref, o_ref, acc_ref, *,
                          TK, hb_lo, max_first, sel_dtype):
    """One (output-row-tile, source-row-block) step of the nearest warp.

    flat_ref: (1,  TK) int32  source flat index per output pixel of this tile,
                              -1 == out-of-image (zero fill).
    x_ref:    (NC, TK)        one source row-block of the input images.
    o_ref:    (NC, TK)        output tile; written once on the last band block.
    acc_ref:  (NC, TK) f32    VMEM scratch accumulator (resident across band).
    """
    i_tile = pl.program_id(0)          # output-row tile
    s_blk = pl.program_id(1)           # source-row block within the static band

    # Source block actually mapped by the x BlockSpec for (i_tile, s_blk); must
    # match the index_map below (same static constants, same clip).
    first = jnp.clip(i_tile - hb_lo, 0, max_first)
    src_base = (first + s_blk) * TK

    # Band-local flat index.  Invalid pixels (-1) and pixels whose source lives
    # in another block fall outside [0, TK) and simply never match the iota,
    # so no extra (src, out) mask / clip is needed.
    local = flat_ref[...] - src_base                            # (1, TK) int32
    src = jax.lax.broadcasted_iota(jnp.int32, (TK, TK), 0)      # (TK, TK)
    sel = (src == local).astype(sel_dtype)                      # exact 0/1 one-hot

    # Gather as an MXU matmul: (NC, TK) x (TK, TK) -> (NC, TK), f32 accumulate.
    part = jnp.dot(x_ref[...], sel, preferred_element_type=jnp.float32)

    @pl.when(s_blk == 0)
    def _():
        acc_ref[...] = part

    @pl.when(s_blk != 0)
    def _():
        acc_ref[...] += part

    @pl.when(s_blk == pl.num_programs(1) - 1)
    def _():
        o_ref[...] = acc_ref[...].astype(o_ref.dtype)


# ---------------------------------------------------------------------------
# Host-side helpers (static tiling / band math, O(HW) coordinate glue)
# ---------------------------------------------------------------------------
def _pick_row_tile(H, W, target_lanes=512):
    """Smallest divisor T of H with T*W a 128-lane multiple and >= target."""
    cands = [t for t in range(1, H + 1) if H % t == 0 and (t * W) % 128 == 0]
    for t in cands:
        if t * W >= target_lanes:
            return t
    return cands[-1] if cands else H


def _band_half_rows(H, W, max_rotation, translation_range):
    """Static upper bound on |round(src_row) - out_row| for any params the
    module can sample with this configuration."""
    rad = abs(float(max_rotation)) * math.pi / 180.0
    s_max = 1.0 if rad >= math.pi / 2 else math.sin(rad)
    c_min = -1.0 if rad >= math.pi else math.cos(rad)
    tx_max = float(translation_range[0]) * W + 0.5      # after round()
    ty_max = float(translation_range[1]) * H + 0.5
    bound = (s_max * 0.5 * (W - 1) + (1.0 - c_min) * 0.5 * (H - 1)
             + s_max * tx_max + ty_max + 0.5)            # +0.5 nearest rounding
    return int(math.ceil(bound)) + 1                     # +1 safety margin


def _inverse_affine_params(angle_deg, tx, ty):
    """torchvision _get_inverse_affine_matrix, center=(0,0), scale=1, shear=0."""
    rot = angle_deg * (math.pi / 180.0)
    cos = jnp.cos(rot)
    sin = jnp.sin(rot)
    m00, m01 = cos, sin
    m10, m11 = -sin, cos
    m02 = m00 * (-tx) + m01 * (-ty)
    m12 = m10 * (-tx) + m11 * (-ty)
    return jnp.stack([m00, m01, m02, m10, m11, m12]).astype(jnp.float32)


def _source_flat_indices(params, H, W):
    """Per-output-pixel nearest source flat index (int32, -1 == zero fill),
    matching affine_grid(align_corners=False) + grid_sample(nearest, zeros)."""
    m00, m01, m02, m10, m11, m12 = (params[i] for i in range(6))
    k = jnp.arange(H * W, dtype=jnp.int32)
    i = (k // W).astype(jnp.float32)
    j = (k % W).astype(jnp.float32)
    xb = j - (0.5 * W - 0.5)
    yb = i - (0.5 * H - 0.5)
    ix = m00 * xb + m01 * yb + m02 + (0.5 * W - 0.5)
    iy = m10 * xb + m11 * yb + m12 + (0.5 * H - 0.5)
    sx = jnp.round(ix).astype(jnp.int32)
    sy = jnp.round(iy).astype(jnp.int32)
    valid = (sx >= 0) & (sx < W) & (sy >= 0) & (sy < H)
    flat = jnp.where(valid, sy * W + sx, -1)
    return flat.reshape(1, H * W)


def _warp_pallas(x2d, flat, *, H, W, HB, target_lanes=512):
    """out[nc, k] = x2d[nc, flat[0, k]] if flat >= 0 else 0, via the TPU kernel."""
    NC, HW = x2d.shape
    T = _pick_row_tile(H, W, target_lanes)   # output rows per tile == source rows per block
    TK = T * W                               # lane-dense (multiple of 128, or full HW)
    n_tiles = H // T

    # Static number of source-row blocks needed per output-row tile.
    hb_lo = -(-HB // T)                      # ceil(HB / T)
    hb_hi = (T - 1 + HB) // T
    n_blk = min(hb_lo + hb_hi + 1, n_tiles)
    max_first = n_tiles - n_blk

    def first_block(i):                      # first band block of output tile i
        return jnp.clip(i - hb_lo, 0, max_first)

    kernel = functools.partial(_onehot_gather_kernel, TK=TK, hb_lo=hb_lo,
                               max_first=max_first, sel_dtype=x2d.dtype)

    steps = n_tiles * n_blk
    sel_bytes = TK * TK * 4
    cost = pl.CostEstimate(
        flops=2 * NC * TK * TK * steps,
        transcendentals=0,
        bytes_accessed=int(x2d.dtype.itemsize) * (steps * NC * TK + 2 * NC * HW)
        + 4 * HW,
    )
    # One-hot tile + int32 iota/compare temps (~3x sel) + acc scratch + IO bufs.
    vmem_limit = min(64 * 1024 * 1024,
                     max(16 * 1024 * 1024,
                         4 * sel_bytes + 4 * (5 * NC * TK + 2 * TK)))

    return pl.pallas_call(
        kernel,
        grid=(n_tiles, n_blk),
        out_shape=jax.ShapeDtypeStruct((NC, HW), x2d.dtype),
        in_specs=[
            # Per-tile source indices (block index unchanged across the band
            # axis -> no re-DMA per band step).
            pl.BlockSpec((1, TK), lambda i, s: (0, i)),
            # Source row-blocks restricted to the static band of output tile i.
            pl.BlockSpec((NC, TK), lambda i, s: (0, first_block(i) + s)),
        ],
        # Lane-dense output tile, resident across the band (reduction) axis.
        out_specs=pl.BlockSpec((NC, TK), lambda i, s: (0, i)),
        scratch_shapes=[pltpu.VMEM((NC, TK), jnp.float32)],
        compiler_params=pltpu.CompilerParams(
            dimension_semantics=("parallel", "arbitrary"),
            vmem_limit_bytes=vmem_limit,
        ),
        cost_estimate=cost,
    )(flat, x2d)


def _warp_reference(x2d, flat):
    """Pure-JAX reference of the same gather (for testing)."""
    idx = flat[0]
    gathered = jnp.take(x2d, jnp.clip(idx, 0, x2d.shape[1] - 1), axis=1)
    return jnp.where(idx[None, :] >= 0, gathered, jnp.zeros((), x2d.dtype))


# ---------------------------------------------------------------------------
# Module forward: MyRandomAffine
# ---------------------------------------------------------------------------
def my_random_affine(x, key, *, translation_p, rotation_p, translation_range,
                     max_rotation):
    """x: (N, C, H, W). Returns affinely transformed x (same shape/dtype)."""
    N, C, H, W = x.shape
    k1, k2, k3, k4, k5 = jax.random.split(key, 5)

    # Parameter sampling (plain-JAX glue) — mirrors MyRandomAffine.forward
    # (note: the module uses `torch.rand(1) <= p`, so `<=` is kept here) and
    # torchvision RandomAffine.get_params.
    apply_rot = jax.random.uniform(k1, ()) <= rotation_p
    apply_tr = jax.random.uniform(k2, ()) <= translation_p

    degrees = jnp.where(apply_rot, jnp.float32(max_rotation), jnp.float32(0.0))
    angle = jax.random.uniform(k3, (), minval=-1.0, maxval=1.0) * degrees

    max_dx = float(translation_range[0]) * W
    max_dy = float(translation_range[1]) * H
    tx = jnp.where(
        apply_tr,
        jnp.round(jax.random.uniform(k4, (), minval=-max_dx, maxval=max_dx)),
        0.0)
    ty = jnp.where(
        apply_tr,
        jnp.round(jax.random.uniform(k5, (), minval=-max_dy, maxval=max_dy)),
        0.0)

    params = _inverse_affine_params(angle, tx, ty)
    flat = _source_flat_indices(params, H, W)
    HB = _band_half_rows(H, W, max_rotation, translation_range)

    # bf16 inputs stay bf16 (one-hot gather is still bit-exact, half the HBM
    # traffic, single-pass MXU); everything else goes through f32.
    compute_dtype = jnp.bfloat16 if x.dtype == jnp.bfloat16 else jnp.float32
    x2d = x.reshape(N * C, H * W).astype(compute_dtype)
    out2d = _warp_pallas(x2d, flat, H=H, W=W, HB=HB)
    return out2d.reshape(N, C, H, W).astype(x.dtype)


# ---------------------------------------------------------------------------
# Self-test
# ---------------------------------------------------------------------------
if __name__ == "__main__":
    key = jax.random.PRNGKey(0)
    kx, kx2, kparams = jax.random.split(key, 3)

    # End-to-end module behaviour (random rotation + translation applied).
    x = jax.random.uniform(kx, (2, 4, 32, 32), dtype=jnp.float32)
    out = my_random_affine(x, kparams, translation_p=1.0, rotation_p=1.0,
                           translation_range=(0.1, 0.1), max_rotation=15.0)
    out = jax.block_until_ready(out)
    assert out.shape == x.shape and bool(jnp.all(jnp.isfinite(out)))

    # Identity: both probabilities zero -> exact passthrough.
    out_id = jax.block_until_ready(
        my_random_affine(x, kparams, translation_p=0.0, rotation_p=0.0,
                         translation_range=(0.1, 0.1), max_rotation=15.0))
    assert bool(jnp.array_equal(out_id, x))

    # Kernel vs. pure-JAX gather reference with fixed, in-range parameters.
    def check(xn, angle, tx, ty, max_rotation, translation_range, exact=False):
        N, C, H, W = xn.shape
        params = _inverse_affine_params(jnp.float32(angle), jnp.float32(tx),
                                        jnp.float32(ty))
        flat = _source_flat_indices(params, H, W)
        HB = _band_half_rows(H, W, max_rotation, translation_range)
        x2d = xn.reshape(N * C, H * W)
        got = jax.block_until_ready(_warp_pallas(x2d, flat, H=H, W=W, HB=HB))
        want = _warp_reference(x2d, flat)
        if exact:
            assert bool(jnp.array_equal(got, want))
        else:
            assert bool(jnp.allclose(got, want, rtol=0.0, atol=5e-3))

    # Rotation + translation inside the configured ranges (grid 2x2), f32 path.
    check(x, angle=10.0, tx=3.0, ty=-2.0,
          max_rotation=15.0, translation_range=(0.1, 0.1))

    # bf16 fast path: one-hot gather must be bit-exact.
    check(x.astype(jnp.bfloat16), angle=10.0, tx=3.0, ty=-2.0,
          max_rotation=15.0, translation_range=(0.1, 0.1), exact=True)

    # Larger image where the static source-row band is a strict subset of the
    # source blocks (exercises the banded contraction + accumulator path).
    x64 = jax.random.uniform(kx2, (1, 2, 64, 64), dtype=jnp.float32)
    check(x64, angle=4.0, tx=2.0, ty=-3.0,
          max_rotation=5.0, translation_range=(0.05, 0.05))

    print("KERNEL_OK")
</pallas_src>

<mosaic_0001>
module attributes {stable_mosaic.version = 11 : i64} {
  func.func @_onehot_gather_kernel(%arg0: i32, %arg1: i32, %arg2: memref<1x512xi32, #tpu.memory_space<vmem>>, %arg3: memref<8x512xf32, #tpu.memory_space<vmem>>, %arg4: memref<8x512xf32, #tpu.memory_space<vmem>>, %arg5: memref<8x512xf32, #tpu.memory_space<vmem>>) attributes {dimension_semantics = [#tpu.dimension_semantics<parallel>, #tpu.dimension_semantics<arbitrary>], iteration_bounds = array<i64: 2, 2>, scalar_prefetch = 0 : i64, scratch_operands = 1 : i64, tpu.core_type = #tpu.core_type<tc>, window_params = [{transform_indices = @transform_0, window_bounds = array<i64: 1, 512>}, {transform_indices = @transform_1, window_bounds = array<i64: 8, 512>}, {transform_indices = @transform_2, window_bounds = array<i64: 8, 512>}]} {
    %c1_i32 = arith.constant 1 : i32
    %0 = arith.subi %arg0, %c1_i32 : i32
    %c0_i32 = arith.constant 0 : i32
    %c0_i32_0 = arith.constant 0 : i32
    %1 = arith.maxsi %c0_i32, %0 : i32
    %2 = arith.minsi %c0_i32_0, %1 : i32
    %3 = arith.addi %2, %arg1 : i32
    %c512_i32 = arith.constant 512 : i32
    %4 = arith.muli %3, %c512_i32 : i32
    %c0 = arith.constant 0 : index
    %c0_1 = arith.constant 0 : index
    %5 = vector.load %arg2[%c0, %c0_1] : memref<1x512xi32, #tpu.memory_space<vmem>>, vector<1x512xi32>
    %6 = vector.broadcast %4 : i32 to vector<1x512xi32>
    %7 = arith.subi %5, %6 : vector<1x512xi32>
    %8 = tpu.iota {dimensions = array<i32: 0>} : vector<512x512xi32>
    %9 = vector.broadcast %7 : vector<1x512xi32> to vector<512x512xi32>
    %10 = arith.cmpi eq, %8, %9 : vector<512x512xi32>
    %11 = arith.extui %10 : vector<512x512xi1> to vector<512x512xi32>
    %12 = arith.sitofp %11 : vector<512x512xi32> to vector<512x512xf32>
    %c0_2 = arith.constant 0 : index
    %c0_3 = arith.constant 0 : index
    %13 = vector.load %arg3[%c0_2, %c0_3] : memref<8x512xf32, #tpu.memory_space<vmem>>, vector<8x512xf32>
    %cst = arith.constant dense<0.000000e+00> : vector<8x512xf32>
    %14 = tpu.matmul %13, %12, %cst {dimension_numbers = #tpu.dot_dimension_numbers<[1], [0], [0], [1], [0, 0, 1, 1], [], []>} : vector<8x512xf32>, vector<512x512xf32>, vector<8x512xf32> -> vector<8x512xf32>
    %c0_i32_4 = arith.constant 0 : i32
    %15 = arith.cmpi eq, %arg1, %c0_i32_4 : i32
    %16 = arith.extui %15 : i1 to i32
    %c0_i32_5 = arith.constant 0 : i32
    %17 = arith.cmpi ne, %16, %c0_i32_5 : i32
    scf.if %17 {
      %c0_10 = arith.constant 0 : index
      %c0_11 = arith.constant 0 : index
      %24 = vector.load %arg5[%c0_10, %c0_11] : memref<8x512xf32, #tpu.memory_space<vmem>>, vector<8x512xf32>
      tpu.vector_store %arg5[%c0_10, %c0_11], %14 {strides = array<i32>} : memref<8x512xf32, #tpu.memory_space<vmem>>, vector<8x512xf32>,
    } else {
    }
    %c0_i32_6 = arith.constant 0 : i32
    %18 = arith.cmpi ne, %arg1, %c0_i32_6 : i32
    %19 = arith.extui %18 : i1 to i32
    %c0_i32_7 = arith.constant 0 : i32
    %20 = arith.cmpi ne, %19, %c0_i32_7 : i32
    scf.if %20 {
      %c0_10 = arith.constant 0 : index
      %c0_11 = arith.constant 0 : index
      %24 = vector.load %arg5[%c0_10, %c0_11] : memref<8x512xf32, #tpu.memory_space<vmem>>, vector<8x512xf32>
      %25 = arith.addf %24, %14 : vector<8x512xf32>
      %c0_12 = arith.constant 0 : index
      %c0_13 = arith.constant 0 : index
      %26 = vector.load %arg5[%c0_12, %c0_13] : memref<8x512xf32, #tpu.memory_space<vmem>>, vector<8x512xf32>
      tpu.vector_store %arg5[%c0_12, %c0_13], %25 {strides = array<i32>} : memref<8x512xf32, #tpu.memory_space<vmem>>, vector<8x512xf32>,
    } else {
    }
    %c1_i32_8 = arith.constant 1 : i32
    %21 = arith.cmpi eq, %arg1, %c1_i32_8 : i32
    %22 = arith.extui %21 : i1 to i32
    %c0_i32_9 = arith.constant 0 : i32
    %23 = arith.cmpi ne, %22, %c0_i32_9 : i32
    scf.if %23 {
      %c0_10 = arith.constant 0 : index
      %c0_11 = arith.constant 0 : index
      %24 = vector.load %arg5[%c0_10, %c0_11] : memref<8x512xf32, #tpu.memory_space<vmem>>, vector<8x512xf32>
      %c0_12 = arith.constant 0 : index
      %c0_13 = arith.constant 0 : index
      %25 = vector.load %arg4[%c0_12, %c0_13] : memref<8x512xf32, #tpu.memory_space<vmem>>, vector<8x512xf32>
      tpu.vector_store %arg4[%c0_12, %c0_13], %24 {strides = array<i32>} : memref<8x512xf32, #tpu.memory_space<vmem>>, vector<8x512xf32>,
    } else {
    }
    return
  }
  func.func @transform_0(%arg0: i32, %arg1: i32) -> (i32, i32) {
    %c0_i32 = arith.constant 0 : i32
    %c0_i32_0 = arith.constant 0 : i32
    return %c0_i32, %arg0 : i32, i32
  }
  func.func @transform_1(%arg0: i32, %arg1: i32) -> (i32, i32) {
    %c1_i32 = arith.constant 1 : i32
    %0 = arith.subi %arg0, %c1_i32 : i32
    %c0_i32 = arith.constant 0 : i32
    %c0_i32_0 = arith.constant 0 : i32
    %1 = arith.maxsi %c0_i32, %0 : i32
    %2 = arith.minsi %c0_i32_0, %1 : i32
    %3 = arith.addi %2, %arg1 : i32
    %c0_i32_1 = arith.constant 0 : i32
    %c0_i32_2 = arith.constant 0 : i32
    return %c0_i32_1, %3 : i32, i32
  }
  func.func @transform_2(%arg0: i32, %arg1: i32) -> (i32, i32) {
    %c0_i32 = arith.constant 0 : i32
    %c0_i32_0 = arith.constant 0 : i32
    return %c0_i32, %arg0 : i32, i32
  }
}

</mosaic_0001>

<bundles_post_ra>
// kernel: tpu_custom_call.1
= control target key start
LH: loop header
LB: loop body
LE: loop exit
PB: predicated region body
PF: predicated region fallthrough
CT: control target
= control target key end

     0   :  { %s4326_s0 = inlined_call_operand.hbm [shape: s32[1,1024], index: 0, kind: input, shape index: {}]   ;;  %s4327_s1 = inlined_call_operand.hbm [shape: f32[8,1024], index: 1, kind: input, shape index: {}]   ;;  %s4328_s2 = inlined_call_operand.hbm [shape: f32[8,1024], index: 2, kind: output, shape index: {}]  }
   0x1   :  { %4349 = sst [smem:[#allocation22_spill]] %s4326_s0 }
   0x2   :  { %7 = vsyncpa [#allocation4], 0 }
   0x3   :  { %9 = vsyncpa [#allocation4 + $0x1], 0 }
   0x4   :  { %10 = vsyncpa [#allocation7], 0 }
   0x5   :  { %12 = vsyncpa [#allocation7 + $0x1], 0 }
   0x6   :  { %13 = vsyncpa [#allocation5], 0 }
   0x7   :  { %15 = vsyncpa [#allocation5 + $0x1], 0  ;;  %s2413_s9 = smov 0   ;;  %s2415_s10 = smov 0  }
   0x8   :  { %s2417_s11 = smov 0   ;;  %s2419_s12 = smov 0  }
   0x9   :  { %s2421_s13 = smov 0   ;;  %s2423_s14 = smov 0  }
   0xa   :  { %s2425_s15 = smov 0   ;;  %s2427_s16 = smov 0  }
   0xb   :  { %s2429_s17 = smov 0   ;;  %s2431_s18 = smov 0  }
   0xc   :  { %s2433_s19 = smov 0  }
   0xd LB: > { %4350 = sst [smem:[#allocation12_spill]] %s2364_s12  ;;  %s1540_s20 = sadd.s32 4294967295, %s2392_s19   ;;  %s2392_s19 = sphi %s2433_s19, %s21_s19   ;;  %s2388_s18 = sphi %s2431_s18, %s4530_s18   ;;  %s2384_s17 = sphi %s2429_s17, %s4529_s17   ;;  %s2380_s16 = sphi %s2427_s16, %s4528_s16   ;;  %s2376_s15 = sphi %s2425_s15, %s4527_s15   ;;  %s2372_s14 = sphi %s2423_s14, %s4526_s14   ;;  %s2368_s13 = sphi %s2421_s13, %s4525_s13   ;;  %s2364_s12 = sphi %s2419_s12, %s4524_s12   ;;  %s2360_s11 = sphi %s2417_s11, %s4523_s11   ;;  %s2356_s10 = sphi %s2415_s10, %s4522_s10   ;;  %s2352_s9 = sphi %s2413_s9, %s4521_s9  }
   0xe   : > { %s1541_s21 = sadd.s32 4294967294, %s2392_s19   ;;  %s33_s22 = sadd.s32 1, %s2388_s18 }
   0xf   : > { %p47_p0 = scmp.ne.s32.totalorder %s2372_s14, %s2368_s13  ;;  %p4329_p1 = scmp.eq.s32.totalorder %s2392_s19, 0 }
  0x10   : > { %p53_p2 = scmp.ne.s32.totalorder %s2368_s13, %s2364_s12  ;;  %p2477_p3 = scmp.eq.s32.totalorder %s1540_s20, 0 }
  0x11   : > { %p2483_p4 = por %p4329_p1, %p47_p0  ;;  %p115_p5 = scmp.eq.s32.totalorder %s1540_s20, 3 }
  0x12   : > { %p2489_p6 = por %p2477_p3, %p53_p2  ;;  %p121_p7 = scmp.eq.s32.totalorder %s1541_s21, 3 }
  0x13   : > { %p2493_p8 = por %p115_p5, %p47_p0  ;;  %p4330_p10 = scmp.lt.s32.totalorder %s2392_s19, 4 }
  0x14   : > { %p2497_p9 = por %p121_p7, %p53_p2  ;;  %s141_s29 = sand.u32 1, %s2372_s14  }
  0x15   : > { %s4354_s27 = scalar_select %p2493_p8, 1, 0 }
  0x16   : > { %s4355_s28 = scalar_select %p2497_p9, 1, 0 }
  0x17   : > { %s2099_s30 = sshll.u32 %s2388_s18, 6  ;;  %s1556_s3 = sshll.u32 %s141_s29, 2 }
  0x18   : > { %4356 = sst [smem:[#allocation13_spill]] %s4355_s28  ;;  %s145_s7 = scalar_lea.vmem [#allocation3], %s1556_s3 }
  0x19   : > { %s4357_s0 = sld [smem:[#allocation22_spill]]  ;;  %s153_s8 = sshll.u32 %s145_s7, 4  ;;  %s154_s8 = int_to_ptr.vmem [resolvable:$true] %s153_s8 }
  0x1a   : > { %p2511_p11 = pnand %p4330_p10, %p2483_p4  ;;  %p1568_p12 = scmp.ge.s32.totalorder %s2392_s19, 1 }
  0x1b   : > { %p183_p13 = scmp.lt.s32.totalorder %s2392_s19, 5  ;;  %s142_s21 = scalar_lea.sflag [#allocation4], %s141_s29 }
  0x1c   : > { %p2214_p0 = pneg %p2511_p11  ;;  %s2225_s23 = scalar_lea.vmem %s154_s8, 64 }
  0x1d   : > { %p2226_p2 = scmp.ne.s32.totalorder %s154_s8, %s2225_s23 }
  0x1f   : > { %s151_s6 = scalar_lea.hbm %s4357_s0, %s2099_s30  ;;  %p2228_p5 = pnand %p2226_p2, %p2214_p0 }
  0x20   : > { %s2394_s30 = smov [#allocation3]  }
  0x21   : > { %p2229_p7 = pneg %p2228_p5  ;;  %s2230_s3 = sshll.u32 %s2394_s30, 4  ;;  %s2231_s3 = int_to_ptr.vmem [resolvable:$false] %s2230_s3 }
  0x22   : > { %s2232_s25 = scalar_lea.vmem %s2231_s3, 128  ;;  %p2233_p1 = scmp.lt.s32.totalorder %s154_s8, %s2231_s3 }
  0x23   : > { %p2234_p4 = scmp.lt.s32.totalorder %s2232_s25, %s2225_s23 }
  0x25   : > { %p2235_p10 = por %p2234_p4, %p2233_p1 }
  0x27   : > { %p2236_p9 = pnand %p2235_p10, %p2229_p7 }
  0x29   : > { %2239 = shalt.err (!%p2236_p9)
}
  0x2a   : > { %2111 = dma.hbm_to_vmem [thread:$0]  (!%p2511_p11), %s151_s6, 64, %s154_s8, %s142_s21  }
  0x2b   : > { %p2525_p1 = pnand %p1568_p12, %p183_p13  ;;  %s30_s29 = sadd.s32 1, %s2384_s17 }
  0x2c   : > { %p31_p9 = scmp.ge.s32.totalorder %s30_s29, 2  ;;  %s78_s4 = sadd.s32 1, %s2360_s11 }
  0x2d   : > { %p85_p10 = scmp.ne.s32.totalorder %s2360_s11, %s2356_s10  ;;  %p91_p0 = scmp.ne.s32.totalorder %s2356_s10, %s2352_s9 }
  0x2e   : > { %s4532_s29 = smov (%p31_p9, %s30_s29), 0  ;;  %s4534_s22 = smov (!%p31_p9, %s33_s22), %s2388_s18 }
  0x2f   : > { %4360 = sst [smem:[#allocation14_spill]] %s4532_s29  ;;  %s75_s5 = ssub.s32 %s2384_s17, %s4532_s29 }
  0x30   : > { %p4361_p11 = scmp.eq.s32.totalorder %s2392_s19, 0  ;;  %p35_p13 = scmp.ge.s32.totalorder %s4534_s22, 2 }
  0x31   : > { %p76_p2 = scmp.eq.s32.totalorder %s75_s5, 0  ;;  %p2550_p5 = por %p91_p0, %p2477_p3 }
  0x32   : > { %p2544_p12 = por %p85_p10, %p4361_p11  ;;  %s160_s9 = sand.u32 1, %s2360_s11  }
  0x33   : > { %s4536_s22 = smov (%p35_p13, %s4534_s22), 0  ;;  %s1559_s21 = sshll.u32 %s160_s9, 5 }
  0x34   : > { %s2558_s8 = scalar_select %p76_p2, %s2360_s11, %s78_s4  }
  0x35   : > { %s37_s20 = ssub.s32 %s2388_s18, %s4536_s22  ;;  %s2100_s30 = sshll.u32 %s2384_s17, 9 }
  0x36   : > { %p38_p7 = scmp.eq.s32.totalorder %s37_s20, 0  ;;  %s4364_s3 = sadd.s32 1, %s2372_s14 }
  0x37   : > { %s176_s24 = scalar_lea.hbm %s4327_s1, %s2100_s30  ;;  %s164_s29 = scalar_lea.vmem [#allocation6], %s1559_s21 }
  0x38   : > { %s2566_s25 = scalar_select %p38_p7, %s2372_s14, %s4364_s3  }
  0x39   : > { %s178_s28 = sshll.u32 %s164_s29, 4  ;;  %p4365_p3 = scmp.lt.s32.totalorder %s2392_s19, 4  ;;  %s179_s28 = int_to_ptr.vmem [resolvable:$true] %s178_s28 }
  0x3a   : > { %s161_s4 = scalar_lea.sflag [#allocation7], %s160_s9  ;;  %s2253_s20 = scalar_lea.vmem %s179_s28, 512 }
  0x3b   : > { %p2575_p4 = pnand %p4365_p3, %p2544_p12  ;;  %p2254_p10 = scmp.ne.s32.totalorder %s179_s28, %s2253_s20 }
  0x3c   : > { %s2395_s3 = smov [#allocation6]  }
  0x3d   : > { %p2242_p9 = pneg %p2575_p4  ;;  %s2258_s0 = sshll.u32 %s2395_s3, 4  ;;  %s2259_s0 = int_to_ptr.vmem [resolvable:$false] %s2258_s0 }
  0x3e   : > { %s2260_s21 = scalar_lea.vmem %s2259_s0, 1024  ;;  %p2261_p13 = scmp.lt.s32.totalorder %s179_s28, %s2259_s0 }
  0x3f   : > { %p2256_p0 = pnand %p2254_p10, %p2242_p9  ;;  %p2262_p2 = scmp.lt.s32.totalorder %s2260_s21, %s2253_s20 }
  0x41   : > { %p2257_p11 = pneg %p2256_p0  ;;  %p2263_p7 = por %p2262_p2, %p2261_p13 }
  0x43   : > { %p2264_p8 = pnand %p2263_p7, %p2257_p11 }
  0x45   : > { %2267 = shalt.err (!%p2264_p8)
}
  0x46   : > { %2114 = dma.hbm_to_vmem [thread:$0]  (!%p2575_p4), %s176_s24, 512, %s179_s28, %s161_s4  }
  0x47   : > { %187 = sbr.rel (%p2525_p1) target bundleno = 467 (0x1d3), region = 28 }
  0x4c   : > { %s2586_s29 = sand.u32 1, %s2368_s13  }
  0x4d   : > { %s1569_s6 = sshll.u32 %s2586_s29, 2  ;;  %s190_s9 = scalar_lea.sflag [#allocation4], %s2586_s29 }
  0x4e   : > { %s193_s30 = scalar_lea.vmem [#allocation3], %s1569_s6 }
  0x4f   : > { %2339 = dma.done.wait (%p2489_p6), %s190_s9, 64  }
  0x50   : > { %2341 = vsyncadd (%p2489_p6), %s190_s9, 4294967232  ;;  %s198_s12 = sand.u32 1, %s2356_s10  }
  0x51   : > { %s1570_s28 = sshll.u32 %s198_s12, 5  ;;  %s199_s23 = scalar_lea.sflag [#allocation7], %s198_s12 }
  0x52   : > { %s2595_s5 = scalar_lea.vmem [#allocation6], %s1570_s28 }
  0x53   : > { %2343 = dma.done.wait (%p2550_p5), %s199_s23, 512  }
  0x54   : > { %2345 = vsyncadd (%p2550_p5), %s199_s23, 4294966784  ;;  %v247_v0 = vlaneseq  ;;  %s1571_s24 = sshll.u32 %s2586_s29, 5  ;;  %s1578_s26 = sshll.u32 %s2376_s15, 9  ;;  %v244_v5 = vld [vmem:[%s193_s30] sm:$0xf]  ;;  %v1097_v9 = vld [vmem:[%s2595_s5 + $0x8] sm:$0xff] }
  0x55   : > { %v245_v2 = vstv %s1578_s26  ;;  %v1099_v10 = vld [vmem:[%s2595_s5 + $0x18] sm:$0xff]  ;;  %1164 = vmatprep.mubr.f32.mxu0 %v1097_v9  ;;  %v2396_v19 = vmov 1.0   ;;  %s4262_s7 = scalar_lea.vmem [#allocation8], %s1571_s24  ;;  %p2091_p6 = scmp.ne.s32.totalorder %s2376_s15, 0 }
  0x56   : > { %v2603_v1 = vshrl.u32 %v247_v0, 7  ;;  %v2607_v6 = vsub.s32 %v244_v5, %v245_v2  ;;  %1235 = vmatprep.mubr.f32.mxu1 %v1099_v10 }
  0x58   : > { %4367 = vst [vmem:[#allocation15_spill] sm:$0xff] %v2603_v1  ;;  %v314_v3 = vsub.s32 0, %v2603_v1  ;;  %v318_v4 = vsub.s32 1, %v2603_v1  ;;  %v2610_v7 = vadd.s32 120, %v2603_v1  ;;  %v2613_v8 = vadd.s32 376, %v2603_v1 }
  0x59   : > { %v2618_v11 = vadd.s32 112, %v2603_v1  ;;  %v2621_v12 = vadd.s32 368, %v2603_v1  ;;  %v2630_v15 = vadd.s32 104, %v2603_v1  ;;  %v2633_v16 = vadd.s32 360, %v2603_v1 }
  0x5a   : > { %v2624_v13 = vrot.slane %v2607_v6, %v314_v3  ;;  %v2627_v14 = vrot.slane %v2607_v6, %v318_v4  ;;  %v2636_v17 = vadd.s32 96, %v2603_v1  ;;  %v2639_v18 = vadd.s32 352, %v2603_v1 }
  0x5b   : > { %v2658_v20 = vadd.s32 88, %v2603_v1  ;;  %v2669_v21 = vadd.s32 344, %v2603_v1  ;;  %v2684_v22 = vadd.s32 80, %v2603_v1  ;;  %v2687_v23 = vadd.s32 336, %v2603_v1 }
  0x5c   : > { %4368 = vst [vmem:[#allocation16_spill] sm:$0xff] %v2639_v18  ;;  %vm389_vm0 = vcmp.eq.s32.totalorder %v2610_v7, %v2627_v14  ;;  %vm517_vm1 = vcmp.eq.s32.totalorder %v2613_v8, %v2627_v14  ;;  %vm388_vm2 = vcmp.eq.s32.totalorder %v2610_v7, %v2624_v13  ;;  %vm516_vm3 = vcmp.eq.s32.totalorder %v2613_v8, %v2624_v13 }
  0x5d   : > { %1835 = vmatprep.subr.msk.mxu0 %vm389_vm0, %v2396_v19  ;;  %1899 = vmatprep.subr.msk.mxu1 %vm517_vm1, %v2396_v19  ;;  %vm385_vm4 = vcmp.eq.s32.totalorder %v2618_v11, %v2627_v14  ;;  %vm513_vm5 = vcmp.eq.s32.totalorder %v2621_v12, %v2627_v14  ;;  %vm384_vm6 = vcmp.eq.s32.totalorder %v2618_v11, %v2624_v13  ;;  %v2702_v24 = vadd.s32 72, %v2603_v1 }
  0x5e   : > { %1836 = vmatpush1.msk.msra.mxu0 %vm388_vm2, %v2396_v19  ;;  %1900 = vmatpush1.msk.msra.mxu1 %vm516_vm3, %v2396_v19  ;;  %vm512_vm7 = vcmp.eq.s32.totalorder %v2621_v12, %v2624_v13  ;;  %vm381_vm8 = vcmp.eq.s32.totalorder %v2630_v15, %v2627_v14  ;;  %vm509_vm9 = vcmp.eq.s32.totalorder %v2633_v16, %v2627_v14  ;;  %v2705_v25 = vadd.s32 328, %v2603_v1 }
  0x5f   : > { %1837 = vmatprep.subr.msk.mxu0 %vm385_vm4, %v2396_v19  ;;  %1901 = vmatprep.subr.msk.mxu1 %vm513_vm5, %v2396_v19  ;;  %vm380_vm10 = vcmp.eq.s32.totalorder %v2630_v15, %v2624_v13  ;;  %vm508_vm11 = vcmp.eq.s32.totalorder %v2633_v16, %v2624_v13  ;;  %vm377_vm12 = vcmp.eq.s32.totalorder %v2636_v17, %v2627_v14  ;;  %v2720_v26 = vadd.s32 64, %v2603_v1 }
  0x60   : > { %1838 = vmatpush1.msk.msra.mxu0 %vm384_vm6, %v2396_v19  ;;  %1902 = vmatpush1.msk.msra.mxu1 %vm512_vm7, %v2396_v19  ;;  %vm505_vm13 = vcmp.eq.s32.totalorder %v2639_v18, %v2627_v14  ;;  %vm376_vm14 = vcmp.eq.s32.totalorder %v2636_v17, %v2624_v13  ;;  %vm504_vm15 = vcmp.eq.s32.totalorder %v2639_v18, %v2624_v13  ;;  %v2723_v27 = vadd.s32 320, %v2603_v1 }
  0x61   : > { %1839 = vmatprep.subr.msk.mxu0 %vm381_vm8, %v2396_v19  ;;  %1903 = vmatprep.subr.msk.mxu1 %vm509_vm9, %v2396_v19  ;;  %vm373_vm0 = vcmp.eq.s32.totalorder %v2658_v20, %v2627_v14  ;;  %vm501_vm1 = vcmp.eq.s32.totalorder %v2669_v21, %v2627_v14  ;;  %vm372_vm2 = vcmp.eq.s32.totalorder %v2658_v20, %v2624_v13  ;;  %v2738_v28 = vadd.s32 56, %v2603_v1 }
  0x62   : > { %1840 = vmatpush1.msk.msra.mxu0 %vm380_vm10, %v2396_v19  ;;  %1904 = vmatpush1.msk.msra.mxu1 %vm508_vm11, %v2396_v19  ;;  %vm500_vm3 = vcmp.eq.s32.totalorder %v2669_v21, %v2624_v13  ;;  %vm369_vm4 = vcmp.eq.s32.totalorder %v2684_v22, %v2627_v14  ;;  %vm497_vm5 = vcmp.eq.s32.totalorder %v2687_v23, %v2627_v14  ;;  %v2741_v29 = vadd.s32 312, %v2603_v1 }
  0x63   : > { %1841 = vmatprep.subr.msk.mxu0 %vm377_vm12, %v2396_v19  ;;  %1905 = vmatprep.subr.msk.mxu1 %vm505_vm13, %v2396_v19  ;;  %vm368_vm6 = vcmp.eq.s32.totalorder %v2684_v22, %v2624_v13  ;;  %vm496_vm7 = vcmp.eq.s32.totalorder %v2687_v23, %v2624_v13  ;;  %vm365_vm8 = vcmp.eq.s32.totalorder %v2702_v24, %v2627_v14  ;;  %v322_v30 = vsub.s32 2, %v2603_v1 }
  0x64   : > { %1842 = vmatpush1.msk.msra.mxu0 %vm376_vm14, %v2396_v19  ;;  %1906 = vmatpush1.msk.msra.mxu1 %vm504_vm15, %v2396_v19  ;;  %vm493_vm9 = vcmp.eq.s32.totalorder %v2705_v25, %v2627_v14  ;;  %vm364_vm10 = vcmp.eq.s32.totalorder %v2702_v24, %v2624_v13  ;;  %vm492_vm11 = vcmp.eq.s32.totalorder %v2705_v25, %v2624_v13  ;;  %v2757_v31 = vadd.s32 48, %v2603_v1 }
  0x65   : > { %1843 = vmatprep.subr.msk.mxu0 %vm373_vm0, %v2396_v19  ;;  %1907 = vmatprep.subr.msk.mxu1 %vm501_vm1, %v2396_v19  ;;  %vm361_vm12 = vcmp.eq.s32.totalorder %v2720_v26, %v2627_v14  ;;  %vm489_vm13 = vcmp.eq.s32.totalorder %v2723_v27, %v2627_v14  ;;  %v2760_v32 = vadd.s32 304, %v2603_v1  ;;  %v326_v33 = vsub.s32 3, %v2603_v1 }
  0x66   : > { %1844 = vmatpush1.msk.msra.mxu0 %vm372_vm2, %v2396_v19  ;;  %1908 = vmatpush1.msk.msra.mxu1 %vm500_vm3, %v2396_v19  ;;  %vm360_vm14 = vcmp.eq.s32.totalorder %v2720_v26, %v2624_v13  ;;  %vm488_vm15 = vcmp.eq.s32.totalorder %v2723_v27, %v2624_v13  ;;  %vm357_vm0 = vcmp.eq.s32.totalorder %v2738_v28, %v2627_v14  ;;  %v2782_v34 = vadd.s32 40, %v2603_v1 }
  0x67   : > { %1845 = vmatprep.subr.msk.mxu0 %vm369_vm4, %v2396_v19  ;;  %1909 = vmatprep.subr.msk.mxu1 %vm497_vm5, %v2396_v19  ;;  %vm485_vm1 = vcmp.eq.s32.totalorder %v2741_v29, %v2627_v14  ;;  %v2785_v35 = vadd.s32 296, %v2603_v1  ;;  %v2788_v36 = vrot.slane %v2607_v6, %v322_v30  ;;  %vm356_vm2 = vcmp.eq.s32.totalorder %v2738_v28, %v2624_v13 }
  0x68   : > { %1846 = vmatpush1.msk.msra.mxu0 %vm368_vm6, %v2396_v19  ;;  %1910 = vmatpush1.msk.msra.mxu1 %vm496_vm7, %v2396_v19  ;;  %vm484_vm3 = vcmp.eq.s32.totalorder %v2741_v29, %v2624_v13  ;;  %vm353_vm4 = vcmp.eq.s32.totalorder %v2757_v31, %v2627_v14  ;;  %vm481_vm5 = vcmp.eq.s32.totalorder %v2760_v32, %v2627_v14  ;;  %v2809_v37 = vadd.s32 32, %v2603_v1 }
  0x69   : > { %1847 = vmatprep.subr.msk.mxu0 %vm365_vm8, %v2396_v19  ;;  %1911 = vmatprep.subr.msk.mxu1 %vm493_vm9, %v2396_v19  ;;  %v2812_v38 = vadd.s32 288, %v2603_v1  ;;  %v2815_v39 = vrot.slane %v2607_v6, %v326_v33  ;;  %vm352_vm6 = vcmp.eq.s32.totalorder %v2757_v31, %v2624_v13  ;;  %vm480_vm7 = vcmp.eq.s32.totalorder %v2760_v32, %v2624_v13 }
  0x6a   : > { %1848 = vmatpush1.msk.msra.mxu0 %vm364_vm10, %v2396_v19  ;;  %1912 = vmatpush1.msk.msra.mxu1 %vm492_vm11, %v2396_v19  ;;  %v2830_v40 = vadd.s32 24, %v2603_v1  ;;  %vm349_vm8 = vcmp.eq.s32.totalorder %v2782_v34, %v2627_v14  ;;  %vm477_vm9 = vcmp.eq.s32.totalorder %v2785_v35, %v2627_v14  ;;  %v2839_v41 = vadd.s32 280, %v2603_v1 }
  0x6b   : > { %1849 = vmatprep.subr.msk.mxu0 %vm361_vm12, %v2396_v19  ;;  %1913 = vmatprep.subr.msk.mxu1 %vm489_vm13, %v2396_v19  ;;  %v2842_v42 = vadd.s32 16, %v2603_v1  ;;  %vm348_vm10 = vcmp.eq.s32.totalorder %v2782_v34, %v2624_v13  ;;  %vm476_vm11 = vcmp.eq.s32.totalorder %v2785_v35, %v2624_v13  ;;  %v2857_v43 = vadd.s32 272, %v2603_v1 }
  0x6c   : > { %1850 = vmatpush1.msk.msra.mxu0 %vm360_vm14, %v2396_v19  ;;  %1914 = vmatpush1.msk.msra.mxu1 %vm488_vm15, %v2396_v19  ;;  %v2860_v44 = vadd.s32 8, %v2603_v1  ;;  %vm345_vm12 = vcmp.eq.s32.totalorder %v2809_v37, %v2627_v14  ;;  %vm473_vm13 = vcmp.eq.s32.totalorder %v2812_v38, %v2627_v14  ;;  %v2869_v45 = vadd.s32 264, %v2603_v1 }
  0x6d   : > { %1851 = vmatprep.subr.msk.mxu0 %vm357_vm0, %v2396_v19  ;;  %1915 = vmatprep.subr.msk.mxu1 %vm485_vm1, %v2396_v19  ;;  %4369 = vst [vmem:[#allocation17_spill] sm:$0xff] %v2857_v43  ;;  %v2872_v46 = vadd.s32 256, %v2603_v1  ;;  %vm344_vm14 = vcmp.eq.s32.totalorder %v2809_v37, %v2624_v13  ;;  %vm472_vm15 = vcmp.eq.s32.totalorder %v2812_v38, %v2624_v13  ;;  %v2887_v47 = vadd.s32 248, %v2603_v1 }
  0x6e   : > { %1852 = vmatpush1.msk.msra.mxu0 %vm356_vm2, %v2396_v19  ;;  %1916 = vmatpush1.msk.msra.mxu1 %vm484_vm3, %v2396_v19  ;;  %v2890_v48 = vadd.s32 504, %v2603_v1  ;;  %vm341_vm0 = vcmp.eq.s32.totalorder %v2830_v40, %v2627_v14  ;;  %vm469_vm1 = vcmp.eq.s32.totalorder %v2839_v41, %v2627_v14  ;;  %v2905_v49 = vadd.s32 240, %v2603_v1 }
  0x6f   : > { %1853 = vmatprep.subr.msk.mxu0 %vm353_vm4, %v2396_v19  ;;  %1917 = vmatprep.subr.msk.mxu1 %vm481_vm5, %v2396_v19  ;;  %v2908_v50 = vadd.s32 496, %v2603_v1  ;;  %vm340_vm2 = vcmp.eq.s32.totalorder %v2830_v40, %v2624_v13  ;;  %vm468_vm3 = vcmp.eq.s32.totalorder %v2839_v41, %v2624_v13  ;;  %v2923_v51 = vadd.s32 232, %v2603_v1 }
  0x70   : > { %1854 = vmatpush1.msk.msra.mxu0 %vm352_vm6, %v2396_v19  ;;  %1918 = vmatpush1.msk.msra.mxu1 %vm480_vm7, %v2396_v19  ;;  %v2926_v52 = vadd.s32 488, %v2603_v1  ;;  %vm337_vm4 = vcmp.eq.s32.totalorder %v2842_v42, %v2627_v14  ;;  %vm465_vm5 = vcmp.eq.s32.totalorder %v2857_v43, %v2627_v14  ;;  %v2941_v53 = vadd.s32 224, %v2603_v1 }
  0x71   : > { %1855 = vmatprep.subr.msk.mxu0 %vm349_vm8, %v2396_v19  ;;  %1919 = vmatprep.subr.msk.mxu1 %vm477_vm9, %v2396_v19  ;;  %v2944_v54 = vadd.s32 480, %v2603_v1  ;;  %vm336_vm6 = vcmp.eq.s32.totalorder %v2842_v42, %v2624_v13  ;;  %vm464_vm7 = vcmp.eq.s32.totalorder %v2857_v43, %v2624_v13  ;;  %vm333_vm8 = vcmp.eq.s32.totalorder %v2860_v44, %v2627_v14 }
  0x72   : > { %1856 = vmatpush1.msk.msra.mxu0 %vm348_vm10, %v2396_v19  ;;  %1920 = vmatpush1.msk.msra.mxu1 %vm476_vm11, %v2396_v19  ;;  %v2961_v55 = vadd.s32 216, %v2603_v1  ;;  %vm461_vm9 = vcmp.eq.s32.totalorder %v2869_v45, %v2627_v14  ;;  %vm332_vm10 = vcmp.eq.s32.totalorder %v2860_v44, %v2624_v13  ;;  %vm460_vm11 = vcmp.eq.s32.totalorder %v2869_v45, %v2624_v13 }
  0x73   : > { %1857 = vmatprep.subr.msk.mxu0 %vm345_vm12, %v2396_v19  ;;  %1921 = vmatprep.subr.msk.mxu1 %vm473_vm13, %v2396_v19  ;;  %v2978_v56 = vadd.s32 472, %v2603_v1  ;;  %vm329_vm12 = vcmp.eq.s32.totalorder %v2603_v1, %v2627_v14  ;;  %vm457_vm13 = vcmp.eq.s32.totalorder %v2872_v46, %v2627_v14  ;;  %v2995_v57 = vadd.s32 208, %v2603_v1 }
  0x74   : > { %1858 = vmatpush1.msk.msra.mxu0 %vm344_vm14, %v2396_v19  ;;  %1922 = vmatpush1.msk.msra.mxu1 %vm472_vm15, %v2396_v19  ;;  %vm328_vm14 = vcmp.eq.s32.totalorder %v2603_v1, %v2624_v13  ;;  %vm456_vm15 = vcmp.eq.s32.totalorder %v2872_v46, %v2624_v13  ;;  %v3012_v58 = vadd.s32 464, %v2603_v1  ;;  %v3029_v59 = vadd.s32 200, %v2603_v1 }
  0x75   : > { %1859 = vmatprep.subr.msk.mxu0 %vm341_vm0, %v2396_v19  ;;  %1923 = vmatprep.subr.msk.mxu1 %vm469_vm1, %v2396_v19  ;;  %4370 = vst [vmem:[#allocation18_spill] sm:$0xff] %v2978_v56  ;;  %4371 = vst [vmem:[#allocation19_spill] sm:$0xff] %v2995_v57  ;;  %vm453_vm0 = vcmp.eq.s32.totalorder %v2887_v47, %v2627_v14  ;;  %vm581_vm1 = vcmp.eq.s32.totalorder %v2890_v48, %v2627_v14  ;;  %v3046_v60 = vadd.s32 456, %v2603_v1 }
  0x76   : > { %1860 = vmatpush1.msk.msra.mxu0 %vm340_vm2, %v2396_v19  ;;  %1924 = vmatpush1.msk.msra.mxu1 %vm468_vm3, %v2396_v19  ;;  %4372 = vst [vmem:[#allocation20_spill] sm:$0xff] %v3012_v58  ;;  %vm452_vm2 = vcmp.eq.s32.totalorder %v2887_v47, %v2624_v13  ;;  %vm580_vm3 = vcmp.eq.s32.totalorder %v2890_v48, %v2624_v13  ;;  %v3063_v61 = vadd.s32 192, %v2603_v1  ;;  %v3080_v62 = vadd.s32 448, %v2603_v1 }
  0x77   : > { %1861 = vmatprep.subr.msk.mxu0 %vm337_vm4, %v2396_v19  ;;  %1925 = vmatprep.subr.msk.mxu1 %vm465_vm5, %v2396_v19  ;;  %vm449_vm4 = vcmp.eq.s32.totalorder %v2905_v49, %v2627_v14  ;;  %vm577_vm5 = vcmp.eq.s32.totalorder %v2908_v50, %v2627_v14  ;;  %4373 = vst [vmem:[#allocation21_spill] sm:$0xff] %v3046_v60  ;;  %v3097_v63 = vadd.s32 184, %v2603_v1  ;;  %v3114_v0 = vadd.s32 440, %v2603_v1 }
  0x78   : > { %1862 = vmatpush1.msk.msra.mxu0 %vm336_vm6, %v2396_v19  ;;  %1926 = vmatpush1.msk.msra.mxu1 %vm464_vm7, %v2396_v19  ;;  %vm448_vm6 = vcmp.eq.s32.totalorder %v2905_v49, %v2624_v13  ;;  %vm576_vm7 = vcmp.eq.s32.totalorder %v2908_v50, %v2624_v13  ;;  %v3131_v2 = vadd.s32 176, %v2603_v1  ;;  %v3148_v3 = vadd.s32 432, %v2603_v1 }
  0x79   : > { %1863 = vmatprep.subr.msk.mxu0 %vm333_vm8, %v2396_v19  ;;  %1927 = vmatprep.subr.msk.mxu1 %vm461_vm9, %v2396_v19  ;;  %vm445_vm8 = vcmp.eq.s32.totalorder %v2923_v51, %v2627_v14  ;;  %vm573_vm9 = vcmp.eq.s32.totalorder %v2926_v52, %v2627_v14  ;;  %v3165_v4 = vadd.s32 168, %v2603_v1  ;;  %v3182_v5 = vadd.s32 424, %v2603_v1 }
  0x7a   : > { %1864 = vmatpush1.msk.msra.mxu0 %vm332_vm10, %v2396_v19  ;;  %1928 = vmatpush1.msk.msra.mxu1 %vm460_vm11, %v2396_v19  ;;  %vm444_vm10 = vcmp.eq.s32.totalorder %v2923_v51, %v2624_v13  ;;  %vm572_vm11 = vcmp.eq.s32.totalorder %v2926_v52, %v2624_v13  ;;  %v3199_v6 = vadd.s32 160, %v2603_v1  ;;  %v3216_v9 = vadd.s32 416, %v2603_v1 }
  0x7b   : > { %1865 = vmatprep.subr.msk.mxu0 %vm329_vm12, %v2396_v19  ;;  %1929 = vmatprep.subr.msk.mxu1 %vm457_vm13, %v2396_v19  ;;  %vm441_vm12 = vcmp.eq.s32.totalorder %v2941_v53, %v2627_v14  ;;  %v3231_v10 = vadd.s32 152, %v2603_v1  ;;  %v3248_v30 = vadd.s32 408, %v2603_v1  ;;  %v3265_v33 = vadd.s32 144, %v2603_v1 }
  0x7c   : > { %1866 = vmatpush1.msk.msra.mxu0 %vm328_vm14, %v2396_v19  ;;  %1930 = vmatpush1.msk.msra.mxu1 %vm456_vm15, %v2396_v19  ;;  %vm440_vm14 = vcmp.eq.s32.totalorder %v2941_v53, %v2624_v13  ;;  %vm568_vm15 = vcmp.eq.s32.totalorder %v2944_v54, %v2624_v13  ;;  %vm408_vm13 = vcmp.eq.s32.totalorder %v3199_v6, %v2624_v13  ;;  %v3370_v18 = vadd.s32 384, %v2603_v1 }
  0x7d   : > { %1867 = vmatprep.subr.msk.mxu0 %vm453_vm0, %v2396_v19  ;;  %1931 = vmatprep.subr.msk.mxu1 %vm581_vm1, %v2396_v19  ;;  %vm565_vm0 = vcmp.eq.s32.totalorder %v2978_v56, %v2627_v14  ;;  %vm436_vm1 = vcmp.eq.s32.totalorder %v2961_v55, %v2624_v13 }
  0x7e   : > { %1868 = vmatpush2.msk.msra.mxu0 %vm452_vm2, %v2396_v19  ;;  %1932 = vmatpush2.msk.msra.mxu1 %vm580_vm3, %v2396_v19  ;;  %vm433_vm2 = vcmp.eq.s32.totalorder %v2995_v57, %v2627_v14  ;;  %vm561_vm3 = vcmp.eq.s32.totalorder %v3012_v58, %v2627_v14 }
  0x7f   : > { %1869 = vmatprep.subr.msk.mxu0 %vm449_vm4, %v2396_v19  ;;  %1933 = vmatprep.subr.msk.mxu1 %vm577_vm5, %v2396_v19  ;;  %vm560_vm4 = vcmp.eq.s32.totalorder %v3012_v58, %v2624_v13  ;;  %vm429_vm5 = vcmp.eq.s32.totalorder %v3029_v59, %v2627_v14  ;;  %v3307_v58 = vadd.s32 136, %v2603_v1 }
  0x80   : > { %1870 = vmatpush2.msk.msra.mxu0 %vm448_vm6, %v2396_v19  ;;  %1934 = vmatpush2.msk.msra.mxu1 %vm576_vm7, %v2396_v19  ;;  %vm428_vm6 = vcmp.eq.s32.totalorder %v3029_v59, %v2624_v13  ;;  %vm556_vm7 = vcmp.eq.s32.totalorder %v3046_v60, %v2624_v13 }
  0x81   : > { %1871 = vmatprep.subr.msk.mxu0 %vm445_vm8, %v2396_v19  ;;  %1935 = vmatprep.subr.msk.mxu1 %vm573_vm9, %v2396_v19  ;;  %vm553_vm8 = vcmp.eq.s32.totalorder %v3080_v62, %v2627_v14  ;;  %vm549_vm9 = vcmp.eq.s32.totalorder %v3114_v0, %v2627_v14 }
  0x82   : > { %1872 = vmatpush2.msk.msra.mxu0 %vm444_vm10, %v2396_v19  ;;  %1936 = vmatpush2.msk.msra.mxu1 %vm572_vm11, %v2396_v19  ;;  %vm4374_vm10 = vcmp.eq.s32.totalorder %v2944_v54, %v2627_v14  ;;  %vm421_vm11 = vcmp.eq.s32.totalorder %v3097_v63, %v2627_v14 }
  0x83   : > { %1873 = vmatprep.subr.msk.mxu0 %vm441_vm12, %v2396_v19  ;;  %1937 = vmatprep.subr.msk.mxu1 %vm4374_vm10, %v2396_v19  ;;  %vm548_vm12 = vcmp.eq.s32.totalorder %v3114_v0, %v2624_v13  ;;  %vm536_vm10 = vcmp.eq.s32.totalorder %v3216_v9, %v2624_v13 }
  0x84   : > { %1874 = vmatpush2.msk.msra.mxu0 %vm440_vm14, %v2396_v19  ;;  %1938 = vmatpush2.msk.msra.mxu1 %vm568_vm15, %v2396_v19  ;;  %vm4375_vm14 = vcmp.eq.s32.totalorder %v2961_v55, %v2627_v14  ;;  %vm416_vm15 = vcmp.eq.s32.totalorder %v3131_v2, %v2624_v13 }
  0x85   : > { %1875 = vmatprep.subr.msk.mxu0 %vm4375_vm14, %v2396_v19  ;;  %1939 = vmatprep.subr.msk.mxu1 %vm565_vm0, %v2396_v19  ;;  %vm4376_vm0 = vcmp.eq.s32.totalorder %v2978_v56, %v2624_v13  ;;  %vm413_vm14 = vcmp.eq.s32.totalorder %v3165_v4, %v2627_v14  ;;  %v3286_v56 = vadd.s32 400, %v2603_v1 }
  0x86   : > { %1876 = vmatpush2.msk.msra.mxu0 %vm436_vm1, %v2396_v19  ;;  %1940 = vmatpush2.msk.msra.mxu1 %vm4376_vm0, %v2396_v19  ;;  %vm412_vm1 = vcmp.eq.s32.totalorder %v3165_v4, %v2624_v13  ;;  %vm409_vm0 = vcmp.eq.s32.totalorder %v3199_v6, %v2627_v14 }
  0x87   : > { %1877 = vmatprep.subr.msk.mxu0 %vm433_vm2, %v2396_v19  ;;  %1941 = vmatprep.subr.msk.mxu1 %vm561_vm3, %v2396_v19  ;;  %vm4377_vm3 = vcmp.eq.s32.totalorder %v2995_v57, %v2624_v13  ;;  %v3328_v57 = vadd.s32 392, %v2603_v1  ;;  %vm401_vm2 = vcmp.eq.s32.totalorder %v3265_v33, %v2627_v14 }
  0x88   : > { %1878 = vmatpush2.msk.msra.mxu0 %vm4377_vm3, %v2396_v19  ;;  %1942 = vmatpush2.msk.msra.mxu1 %vm560_vm4, %v2396_v19  ;;  %vm4378_vm4 = vcmp.eq.s32.totalorder %v3046_v60, %v2627_v14  ;;  %v3349_v60 = vadd.s32 128, %v2603_v1  ;;  %vm4381_vm3 = vcmp.eq.s32.totalorder %v3080_v62, %v2624_v13  ;;  %v3589_v1 = vld [vmem:[%s2595_s5] sm:$0xff] }
  0x89   : > { %1879 = vmatprep.subr.msk.mxu0 %vm429_vm5, %v2396_v19  ;;  %1943 = vmatprep.subr.msk.mxu1 %vm4378_vm4, %v2396_v19  ;;  %vm405_vm4 = vcmp.eq.s32.totalorder %v3231_v10, %v2627_v14  ;;  %vm4382_vm5 = vcmp.eq.s32.totalorder %v3097_v63, %v2624_v13 }
  0x8a   : > { %1880 = vmatpush2.msk.msra.mxu0 %vm428_vm6, %v2396_v19  ;;  %1944 = vmatpush2.msk.msra.mxu1 %vm556_vm7, %v2396_v19  ;;  %vm4379_vm7 = vcmp.eq.s32.totalorder %v3063_v61, %v2627_v14  ;;  %vm4383_vm6 = vcmp.eq.s32.totalorder %v3131_v2, %v2627_v14 }
  0x8b   : > { %1881 = vmatprep.subr.msk.mxu0 %vm4379_vm7, %v2396_v19  ;;  %1945 = vmatprep.subr.msk.mxu1 %vm553_vm8, %v2396_v19  ;;  %vm4380_vm8 = vcmp.eq.s32.totalorder %v3063_v61, %v2624_v13  ;;  %vm393_vm7 = vcmp.eq.s32.totalorder %v3349_v60, %v2627_v14 }
  0x8c   : > { %1882 = vmatpush2.msk.msra.mxu0 %vm4380_vm8, %v2396_v19  ;;  %1946 = vmatpush2.msk.msra.mxu1 %vm4381_vm3, %v2396_v19  ;;  %vm400_vm3 = vcmp.eq.s32.totalorder %v3265_v33, %v2624_v13  ;;  %vm396_vm8 = vcmp.eq.s32.totalorder %v3307_v58, %v2624_v13 }
  0x8d   : > { %1883 = vmatprep.subr.msk.mxu0 %vm421_vm11, %v2396_v19  ;;  %1947 = vmatprep.subr.msk.mxu1 %vm549_vm9, %v2396_v19  ;;  %vm397_vm9 = vcmp.eq.s32.totalorder %v3307_v58, %v2627_v14  ;;  %vm392_vm11 = vcmp.eq.s32.totalorder %v3349_v60, %v2624_v13 }
  0x8e   : > { %1884 = vmatpush2.msk.msra.mxu0 %vm4382_vm5, %v2396_v19  ;;  %1948 = vmatpush2.msk.msra.mxu1 %vm548_vm12, %v2396_v19  ;;  %vm4384_vm12 = vcmp.eq.s32.totalorder %v3148_v3, %v2627_v14  ;;  %vm4390_vm5 = vcmp.eq.s32.totalorder %v3231_v10, %v2624_v13 }
  0x8f   : > { %1885 = vmatprep.subr.msk.mxu0 %vm4383_vm6, %v2396_v19  ;;  %1949 = vmatprep.subr.msk.mxu1 %vm4384_vm12, %v2396_v19  ;;  %vm4385_vm12 = vcmp.eq.s32.totalorder %v3148_v3, %v2624_v13  ;;  %vm351_vm6 = vcmp.eq.s32.totalorder %v2782_v34, %v2815_v39 }
  0x90   : > { %1886 = vmatpush2.msk.msra.mxu0 %vm416_vm15, %v2396_v19  ;;  %1950 = vmatpush2.msk.msra.mxu1 %vm4385_vm12, %v2396_v19  ;;  %vm4386_vm12 = vcmp.eq.s32.totalorder %v3182_v5, %v2627_v14  ;;  %vm483_vm15 = vcmp.eq.s32.totalorder %v2760_v32, %v2815_v39 }
  0x91   : > { %1887 = vmatprep.subr.msk.mxu0 %vm413_vm14, %v2396_v19  ;;  %1951 = vmatprep.subr.msk.mxu1 %vm4386_vm12, %v2396_v19  ;;  %vm358_vm14 = vcmp.eq.s32.totalorder %v2738_v28, %v2788_v36  ;;  %vm4387_vm12 = vcmp.eq.s32.totalorder %v3182_v5, %v2624_v13 }
  0x92   : > { %1888 = vmatpush2.msk.msra.mxu0 %vm412_vm1, %v2396_v19  ;;  %1952 = vmatpush2.msk.msra.mxu1 %vm4387_vm12, %v2396_v19  ;;  %vm4388_vm1 = vcmp.eq.s32.totalorder %v3216_v9, %v2627_v14  ;;  %vm354_vm12 = vcmp.eq.s32.totalorder %v2757_v31, %v2788_v36 }
  0x93   : > { %1889 = vmatprep.subr.msk.mxu0 %vm409_vm0, %v2396_v19  ;;  %1953 = vmatprep.subr.msk.mxu1 %vm4388_vm1, %v2396_v19  ;;  %vm346_vm1 = vcmp.eq.s32.totalorder %v2809_v37, %v2788_v36  ;;  %vm339_vm0 = vcmp.eq.s32.totalorder %v2842_v42, %v2815_v39 }
  0x94   : > { %1890 = vmatpush2.msk.msra.mxu0 %vm408_vm13, %v2396_v19  ;;  %1954 = vmatpush2.msk.msra.mxu1 %vm536_vm10, %v2396_v19  ;;  %vm4389_vm13 = vcmp.eq.s32.totalorder %v3248_v30, %v2627_v14  ;;  %vm466_vm10 = vcmp.eq.s32.totalorder %v2857_v43, %v2788_v36  ;;  %v3592_v43 = vld [vmem:[%s2595_s5 + $0x10] sm:$0xff] }
  0x95   : > { %1891 = vmatprep.subr.msk.mxu0 %vm405_vm4, %v2396_v19  ;;  %1955 = vmatprep.subr.msk.mxu1 %vm4389_vm13, %v2396_v19  ;;  %vm4391_vm4 = vcmp.eq.s32.totalorder %v3248_v30, %v2624_v13  ;;  %vm474_vm13 = vcmp.eq.s32.totalorder %v2812_v38, %v2788_v36 }
  0x96   : > { %1892 = vmatpush2.msk.msra.mxu0 %vm4390_vm5, %v2396_v19  ;;  %1956 = vmatpush2.msk.msra.mxu1 %vm4391_vm4, %v2396_v19  ;;  %vm4392_vm5 = vcmp.eq.s32.totalorder %v3286_v56, %v2627_v14  ;;  %vm4407_vm4 = vcmp.eq.s32.totalorder %v2630_v15, %v2815_v39 }
  0x97   : > { %1893 = vmatprep.subr.msk.mxu0 %vm401_vm2, %v2396_v19  ;;  %1957 = vmatprep.subr.msk.mxu1 %vm4392_vm5, %v2396_v19  ;;  %vm4393_vm2 = vcmp.eq.s32.totalorder %v3286_v56, %v2624_v13  ;;  %vm4402_vm5 = vcmp.eq.s32.totalorder %v2618_v11, %v2815_v39 }
  0x98   : > { %1894 = vmatpush2.msk.msra.mxu0 %vm400_vm3, %v2396_v19  ;;  %1958 = vmatpush2.msk.msra.mxu1 %vm4393_vm2, %v2396_v19  ;;  %vm4394_vm3 = vcmp.eq.s32.totalorder %v3328_v57, %v2627_v14  ;;  %vm335_vm2 = vcmp.eq.s32.totalorder %v2860_v44, %v2815_v39 }
  0x99   : > { %1895 = vmatprep.subr.msk.mxu0 %vm397_vm9, %v2396_v19  ;;  %1959 = vmatprep.subr.msk.mxu1 %vm4394_vm3, %v2396_v19  ;;  %vm4395_vm9 = vcmp.eq.s32.totalorder %v3328_v57, %v2624_v13  ;;  %vm462_vm3 = vcmp.eq.s32.totalorder %v2869_v45, %v2788_v36 }
  0x9a   : > { %1896 = vmatpush2.msk.msra.mxu0 %vm396_vm8, %v2396_v19  ;;  %1960 = vmatpush2.msk.msra.mxu1 %vm4395_vm9, %v2396_v19  ;;  %vm4396_vm8 = vcmp.eq.s32.totalorder %v3370_v18, %v2627_v14  ;;  %vm4399_vm9 = vcmp.eq.s32.totalorder %v2613_v8, %v2815_v39  ;;  %v4449_v14 = vld [vmem:[#allocation17_spill] sm:$0xff] }
  0x9b   : > { %1897 = vmatprep.subr.msk.mxu0 %vm393_vm7, %v2396_v19  ;;  %1961 = vmatprep.subr.msk.mxu1 %vm4396_vm8, %v2396_v19  ;;  %vm4397_vm7 = vcmp.eq.s32.totalorder %v3370_v18, %v2624_v13  ;;  %vm4398_vm8 = vcmp.eq.s32.totalorder %v2610_v7, %v2815_v39  ;;  %v4416_v13 = vld [vmem:[#allocation21_spill] sm:$0xff] }
  0x9c   : > { %1898 = vmatpush2.msk.msra.mxu0 %vm392_vm11, %v2396_v19  ;;  %1962 = vmatpush2.msk.msra.mxu1 %vm4397_vm7, %v2396_v19  ;;  %vm4400_vm7 = vcmp.eq.s32.totalorder %v2610_v7, %v2788_v36  ;;  %vm4404_vm11 = vcmp.eq.s32.totalorder %v2618_v11, %v2788_v36  ;;  %v4406_v7 = vld [vmem:[#allocation18_spill] sm:$0xff]  ;;  %v4410_v11 = vld [vmem:[#allocation20_spill] sm:$0xff] }
  0x9d   : > { %1165 = vmatmul.mubr.f32.vlgmr.msra.gmra.mxu0 %v3589_v1  ;;  %1236 = vmatmul.mubr.f32.vlgmr.msra.gmra.mxu1 %v3592_v43 }
  0x9e   : > { %1963 = vmatprep.subr.msk.mxu0 %vm4398_vm8, %v2396_v19  ;;  %2027 = vmatprep.subr.msk.mxu1 %vm4399_vm9, %v2396_v19  ;;  %vm4401_vm8 = vcmp.eq.s32.totalorder %v2613_v8, %v2788_v36  ;;  %v4409_v8 = vld [vmem:[#allocation19_spill] sm:$0xff]  ;;  %vm4411_vm9 = vcmp.eq.s32.totalorder %v2630_v15, %v2788_v36 }
  0x9f   : > { %1964 = vmatpush1.msk.msra.mxu0 %vm4400_vm7, %v2396_v19  ;;  %2028 = vmatpush1.msk.msra.mxu1 %vm4401_vm8, %v2396_v19  ;;  %vm4403_vm7 = vcmp.eq.s32.totalorder %v2621_v12, %v2815_v39  ;;  %vm4413_vm8 = vcmp.eq.s32.totalorder %v2636_v17, %v2815_v39  ;;  %v4452_v15 = vld [vmem:[#allocation15_spill] sm:$0xff] }
  0xa0   : > { %1965 = vmatprep.subr.msk.mxu0 %vm4402_vm5, %v2396_v19  ;;  %2029 = vmatprep.subr.msk.mxu1 %vm4403_vm7, %v2396_v19  ;;  %vm4405_vm5 = vcmp.eq.s32.totalorder %v2621_v12, %v2788_v36  ;;  %v4414_v12 = vld [vmem:[#allocation16_spill] sm:$0xff]  ;;  %vm4417_vm7 = vcmp.eq.s32.totalorder %v2636_v17, %v2788_v36  ;;  %v2211_v17 = vld [vmem:[%s2595_s5 + $0x18] sm:$0xff] }
  0xa1   : > { %1966 = vmatpush1.msk.msra.mxu0 %vm4404_vm11, %v2396_v19  ;;  %2030 = vmatpush1.msk.msra.mxu1 %vm4405_vm5, %v2396_v19  ;;  %vm4408_vm11 = vcmp.eq.s32.totalorder %v2633_v16, %v2815_v39  ;;  %vm4419_vm5 = vcmp.eq.s32.totalorder %v2658_v20, %v2815_v39 }
  0xa2   : > { %1967 = vmatprep.subr.msk.mxu0 %vm4407_vm4, %v2396_v19  ;;  %2031 = vmatprep.subr.msk.mxu1 %vm4408_vm11, %v2396_v19  ;;  %vm4412_vm4 = vcmp.eq.s32.totalorder %v2633_v16, %v2788_v36  ;;  %vm4421_vm11 = vcmp.eq.s32.totalorder %v2658_v20, %v2788_v36  ;;  %v2210_v16 = vld [vmem:[%s2595_s5 + $0x8] sm:$0xff] }
  0xa3   : > { %1968 = vmatpush1.msk.msra.mxu0 %vm4411_vm9, %v2396_v19  ;;  %2032 = vmatpush1.msk.msra.mxu1 %vm4412_vm4, %v2396_v19  ;;  %vm4415_vm9 = vcmp.eq.s32.totalorder %v4414_v12, %v2815_v39  ;;  %vm4423_vm4 = vcmp.eq.s32.totalorder %v2684_v22, %v2815_v39 }
  0xa4   : > { %1969 = vmatprep.subr.msk.mxu0 %vm4413_vm8, %v2396_v19  ;;  %2033 = vmatprep.subr.msk.mxu1 %vm4415_vm9, %v2396_v19  ;;  %vm4418_vm8 = vcmp.eq.s32.totalorder %v4414_v12, %v2788_v36  ;;  %vm4425_vm9 = vcmp.eq.s32.totalorder %v2684_v22, %v2788_v36 }
  0xa5   : > { %1970 = vmatpush1.msk.msra.mxu0 %vm4417_vm7, %v2396_v19  ;;  %2034 = vmatpush1.msk.msra.mxu1 %vm4418_vm8, %v2396_v19  ;;  %vm4420_vm7 = vcmp.eq.s32.totalorder %v2669_v21, %v2815_v39  ;;  %vm4427_vm8 = vcmp.eq.s32.totalorder %v2702_v24, %v2815_v39 }
  0xa6   : > { %1971 = vmatprep.subr.msk.mxu0 %vm4419_vm5, %v2396_v19  ;;  %2035 = vmatprep.subr.msk.mxu1 %vm4420_vm7, %v2396_v19  ;;  %vm4422_vm5 = vcmp.eq.s32.totalorder %v2669_v21, %v2788_v36  ;;  %vm4429_vm7 = vcmp.eq.s32.totalorder %v2702_v24, %v2788_v36 }
  0xa7   : > { %1972 = vmatpush1.msk.msra.mxu0 %vm4421_vm11, %v2396_v19  ;;  %2036 = vmatpush1.msk.msra.mxu1 %vm4422_vm5, %v2396_v19  ;;  %vm4424_vm11 = vcmp.eq.s32.totalorder %v2687_v23, %v2815_v39  ;;  %vm4431_vm5 = vcmp.eq.s32.totalorder %v2720_v26, %v2815_v39 }
  0xa8   : > { %1973 = vmatprep.subr.msk.mxu0 %vm4423_vm4, %v2396_v19  ;;  %2037 = vmatprep.subr.msk.mxu1 %vm4424_vm11, %v2396_v19  ;;  %vm4426_vm4 = vcmp.eq.s32.totalorder %v2687_v23, %v2788_v36  ;;  %vm4433_vm11 = vcmp.eq.s32.totalorder %v2720_v26, %v2788_v36 }
  0xa9   : > { %1974 = vmatpush1.msk.msra.mxu0 %vm4425_vm9, %v2396_v19  ;;  %2038 = vmatpush1.msk.msra.mxu1 %vm4426_vm4, %v2396_v19  ;;  %vm4428_vm9 = vcmp.eq.s32.totalorder %v2705_v25, %v2815_v39  ;;  %vm4435_vm4 = vcmp.eq.s32.totalorder %v2738_v28, %v2815_v39 }
  0xaa   : > { %1975 = vmatprep.subr.msk.mxu0 %vm4427_vm8, %v2396_v19  ;;  %2039 = vmatprep.subr.msk.mxu1 %vm4428_vm9, %v2396_v19  ;;  %vm4430_vm8 = vcmp.eq.s32.totalorder %v2705_v25, %v2788_v36  ;;  %vm402_vm9 = vcmp.eq.s32.totalorder %v3265_v33, %v2788_v36 }
  0xab   : > { %1976 = vmatpush1.msk.msra.mxu0 %vm4429_vm7, %v2396_v19  ;;  %2040 = vmatpush1.msk.msra.mxu1 %vm4430_vm8, %v2396_v19  ;;  %vm4432_vm7 = vcmp.eq.s32.totalorder %v2723_v27, %v2815_v39  ;;  %vm4438_vm8 = vcmp.eq.s32.totalorder %v2757_v31, %v2815_v39 }
  0xac   : > { %1977 = vmatprep.subr.msk.mxu0 %vm4431_vm5, %v2396_v19  ;;  %2041 = vmatprep.subr.msk.mxu1 %vm4432_vm7, %v2396_v19  ;;  %vm4434_vm5 = vcmp.eq.s32.totalorder %v2723_v27, %v2788_v36  ;;  %vm395_vm7 = vcmp.eq.s32.totalorder %v3349_v60, %v2815_v39 }
  0xad   : > { %1978 = vmatpush1.msk.msra.mxu0 %vm4433_vm11, %v2396_v19  ;;  %2042 = vmatpush1.msk.msra.mxu1 %vm4434_vm5, %v2396_v19  ;;  %vm4436_vm11 = vcmp.eq.s32.totalorder %v2741_v29, %v2815_v39  ;;  %vm4441_vm5 = vcmp.eq.s32.totalorder %v2782_v34, %v2788_v36 }
  0xae   : > { %1979 = vmatprep.subr.msk.mxu0 %vm4435_vm4, %v2396_v19  ;;  %2043 = vmatprep.subr.msk.mxu1 %vm4436_vm11, %v2396_v19  ;;  %vm4437_vm4 = vcmp.eq.s32.totalorder %v2741_v29, %v2788_v36  ;;  %vm398_vm11 = vcmp.eq.s32.totalorder %v3307_v58, %v2788_v36 }
  0xaf   : > { %1980 = vmatpush1.msk.msra.mxu0 %vm358_vm14, %v2396_v19  ;;  %2044 = vmatpush1.msk.msra.mxu1 %vm4437_vm4, %v2396_v19  ;;  %vm523_vm14 = vcmp.eq.s32.totalorder %v3370_v18, %v2815_v39  ;;  %vm394_vm4 = vcmp.eq.s32.totalorder %v3349_v60, %v2788_v36 }
  0xb0   : > { %1981 = vmatprep.subr.msk.mxu0 %vm4438_vm8, %v2396_v19  ;;  %2045 = vmatprep.subr.msk.mxu1 %vm483_vm15, %v2396_v19  ;;  %vm4439_vm8 = vcmp.eq.s32.totalorder %v2760_v32, %v2788_v36  ;;  %vm4440_vm15 = vcmp.eq.s32.totalorder %v2785_v35, %v2815_v39 }
  0xb1   : > { %1982 = vmatpush1.msk.msra.mxu0 %vm354_vm12, %v2396_v19  ;;  %2046 = vmatpush1.msk.msra.mxu1 %vm4439_vm8, %v2396_v19  ;;  %vm4442_vm12 = vcmp.eq.s32.totalorder %v2785_v35, %v2788_v36  ;;  %vm4443_vm8 = vcmp.eq.s32.totalorder %v2809_v37, %v2815_v39 }
  0xb2   : > { %1983 = vmatprep.subr.msk.mxu0 %vm351_vm6, %v2396_v19  ;;  %2047 = vmatprep.subr.msk.mxu1 %vm4440_vm15, %v2396_v19  ;;  %vm4444_vm6 = vcmp.eq.s32.totalorder %v2812_v38, %v2815_v39  ;;  %vm4446_vm15 = vcmp.eq.s32.totalorder %v2839_v41, %v2815_v39 }
  0xb3   : > { %1984 = vmatpush1.msk.msra.mxu0 %vm4441_vm5, %v2396_v19  ;;  %2048 = vmatpush1.msk.msra.mxu1 %vm4442_vm12, %v2396_v19  ;;  %vm4445_vm5 = vcmp.eq.s32.totalorder %v2830_v40, %v2815_v39  ;;  %vm4447_vm12 = vcmp.eq.s32.totalorder %v2830_v40, %v2788_v36 }
  0xb4   : > { %1985 = vmatprep.subr.msk.mxu0 %vm4443_vm8, %v2396_v19  ;;  %2049 = vmatprep.subr.msk.mxu1 %vm4444_vm6, %v2396_v19  ;;  %vm4451_vm8 = vcmp.eq.s32.totalorder %v2842_v42, %v2788_v36  ;;  %vm331_vm6 = vcmp.eq.s32.totalorder %v4452_v15, %v2815_v39 }
  0xb5   : > { %1986 = vmatpush1.msk.msra.mxu0 %vm346_vm1, %v2396_v19  ;;  %2050 = vmatpush1.msk.msra.mxu1 %vm474_vm13, %v2396_v19  ;;  %vm4448_vm1 = vcmp.eq.s32.totalorder %v2839_v41, %v2788_v36  ;;  %vm4450_vm13 = vcmp.eq.s32.totalorder %v4449_v14, %v2815_v39 }
  0xb6   : > { %1987 = vmatprep.subr.msk.mxu0 %vm4445_vm5, %v2396_v19  ;;  %2051 = vmatprep.subr.msk.mxu1 %vm4446_vm15, %v2396_v19  ;;  %vm330_vm5 = vcmp.eq.s32.totalorder %v4452_v15, %v2788_v36  ;;  %vm4456_vm15 = vcmp.eq.s32.totalorder %v2872_v46, %v2788_v36 }
  0xb7   : > { %1988 = vmatpush1.msk.msra.mxu0 %vm4447_vm12, %v2396_v19  ;;  %2052 = vmatpush1.msk.msra.mxu1 %vm4448_vm1, %v2396_v19  ;;  %vm4457_vm12 = vcmp.eq.s32.totalorder %v2887_v47, %v2815_v39  ;;  %vm4459_vm1 = vcmp.eq.s32.totalorder %v2887_v47, %v2788_v36 }
  0xb8   : > { %1989 = vmatprep.subr.msk.mxu0 %vm339_vm0, %v2396_v19  ;;  %2053 = vmatprep.subr.msk.mxu1 %vm4450_vm13, %v2396_v19  ;;  %vm4453_vm0 = vcmp.eq.s32.totalorder %v2869_v45, %v2815_v39  ;;  %vm4460_vm13 = vcmp.eq.s32.totalorder %v2890_v48, %v2788_v36 }
  0xb9   : > { %1990 = vmatpush1.msk.msra.mxu0 %vm4451_vm8, %v2396_v19  ;;  %2054 = vmatpush1.msk.msra.mxu1 %vm466_vm10, %v2396_v19  ;;  %vm4454_vm10 = vcmp.eq.s32.totalorder %v2860_v44, %v2788_v36  ;;  %vm4461_vm8 = vcmp.eq.s32.totalorder %v2905_v49, %v2815_v39 }
  0xba   : > { %1991 = vmatprep.subr.msk.mxu0 %vm335_vm2, %v2396_v19  ;;  %2055 = vmatprep.subr.msk.mxu1 %vm4453_vm0, %v2396_v19  ;;  %vm4455_vm2 = vcmp.eq.s32.totalorder %v2872_v46, %v2815_v39  ;;  %vm4463_vm0 = vcmp.eq.s32.totalorder %v2905_v49, %v2788_v36 }
  0xbb   : > { %1992 = vmatpush1.msk.msra.mxu0 %vm4454_vm10, %v2396_v19  ;;  %2056 = vmatpush1.msk.msra.mxu1 %vm462_vm3, %v2396_v19  ;;  %vm4458_vm3 = vcmp.eq.s32.totalorder %v2890_v48, %v2815_v39  ;;  %vm4465_vm10 = vcmp.eq.s32.totalorder %v2923_v51, %v2815_v39 }
  0xbc   : > { %1993 = vmatprep.subr.msk.mxu0 %vm331_vm6, %v2396_v19  ;;  %2057 = vmatprep.subr.msk.mxu1 %vm4455_vm2, %v2396_v19  ;;  %vm4462_vm6 = vcmp.eq.s32.totalorder %v2908_v50, %v2815_v39  ;;  %vm4466_vm2 = vcmp.eq.s32.totalorder %v2926_v52, %v2815_v39 }
  0xbd   : > { %1994 = vmatpush1.msk.msra.mxu0 %vm330_vm5, %v2396_v19  ;;  %2058 = vmatpush1.msk.msra.mxu1 %vm4456_vm15, %v2396_v19  ;;  %vm4464_vm5 = vcmp.eq.s32.totalorder %v2908_v50, %v2788_v36  ;;  %vm4467_vm15 = vcmp.eq.s32.totalorder %v2923_v51, %v2788_v36 }
  0xbe   : > { %1995 = vmatprep.subr.msk.mxu0 %vm4457_vm12, %v2396_v19  ;;  %2059 = vmatprep.subr.msk.mxu1 %vm4458_vm3, %v2396_v19  ;;  %vm4468_vm12 = vcmp.eq.s32.totalorder %v2926_v52, %v2788_v36  ;;  %vm4469_vm3 = vcmp.eq.s32.totalorder %v2941_v53, %v2815_v39 }
  0xbf   : > { %1996 = vmatpush2.msk.msra.mxu0 %vm4459_vm1, %v2396_v19  ;;  %2060 = vmatpush2.msk.msra.mxu1 %vm4460_vm13, %v2396_v19  ;;  %vm4470_vm1 = vcmp.eq.s32.totalorder %v2944_v54, %v2815_v39  ;;  %vm4471_vm13 = vcmp.eq.s32.totalorder %v2941_v53, %v2788_v36 }
  0xc0   : > { %1997 = vmatprep.subr.msk.mxu0 %vm4461_vm8, %v2396_v19  ;;  %2061 = vmatprep.subr.msk.mxu1 %vm4462_vm6, %v2396_v19  ;;  %vm4472_vm8 = vcmp.eq.s32.totalorder %v2944_v54, %v2788_v36  ;;  %vm4473_vm6 = vcmp.eq.s32.totalorder %v2961_v55, %v2815_v39 }
  0xc1   : > { %1998 = vmatpush2.msk.msra.mxu0 %vm4463_vm0, %v2396_v19  ;;  %2062 = vmatpush2.msk.msra.mxu1 %vm4464_vm5, %v2396_v19  ;;  %vm4474_vm0 = vcmp.eq.s32.totalorder %v4406_v7, %v2815_v39  ;;  %vm4475_vm5 = vcmp.eq.s32.totalorder %v2961_v55, %v2788_v36 }
  0xc2   : > { %1999 = vmatprep.subr.msk.mxu0 %vm4465_vm10, %v2396_v19  ;;  %2063 = vmatprep.subr.msk.mxu1 %vm4466_vm2, %v2396_v19  ;;  %vm4476_vm10 = vcmp.eq.s32.totalorder %v4406_v7, %v2788_v36  ;;  %vm4477_vm2 = vcmp.eq.s32.totalorder %v4409_v8, %v2815_v39 }
  0xc3   : > { %2000 = vmatpush2.msk.msra.mxu0 %vm4467_vm15, %v2396_v19  ;;  %2064 = vmatpush2.msk.msra.mxu1 %vm4468_vm12, %v2396_v19  ;;  %vm4478_vm15 = vcmp.eq.s32.totalorder %v4410_v11, %v2815_v39  ;;  %vm4479_vm12 = vcmp.eq.s32.totalorder %v4409_v8, %v2788_v36 }
  0xc4   : > { %2001 = vmatprep.subr.msk.mxu0 %vm4469_vm3, %v2396_v19  ;;  %2065 = vmatprep.subr.msk.mxu1 %vm4470_vm1, %v2396_v19  ;;  %vm4480_vm3 = vcmp.eq.s32.totalorder %v4410_v11, %v2788_v36  ;;  %vm4481_vm1 = vcmp.eq.s32.totalorder %v3029_v59, %v2815_v39 }
  0xc5   : > { %2002 = vmatpush2.msk.msra.mxu0 %vm4471_vm13, %v2396_v19  ;;  %2066 = vmatpush2.msk.msra.mxu1 %vm4472_vm8, %v2396_v19  ;;  %vm4482_vm13 = vcmp.eq.s32.totalorder %v4416_v13, %v2815_v39  ;;  %vm4483_vm8 = vcmp.eq.s32.totalorder %v3029_v59, %v2788_v36 }
  0xc6   : > { %2003 = vmatprep.subr.msk.mxu0 %vm4473_vm6, %v2396_v19  ;;  %2067 = vmatprep.subr.msk.mxu1 %vm4474_vm0, %v2396_v19  ;;  %vm4484_vm6 = vcmp.eq.s32.totalorder %v4416_v13, %v2788_v36  ;;  %vm4485_vm0 = vcmp.eq.s32.totalorder %v3063_v61, %v2815_v39 }
  0xc7   : > { %2004 = vmatpush2.msk.msra.mxu0 %vm4475_vm5, %v2396_v19  ;;  %2068 = vmatpush2.msk.msra.mxu1 %vm4476_vm10, %v2396_v19  ;;  %vm4486_vm5 = vcmp.eq.s32.totalorder %v3080_v62, %v2815_v39  ;;  %vm4487_vm10 = vcmp.eq.s32.totalorder %v3063_v61, %v2788_v36 }
  0xc8   : > { %2005 = vmatprep.subr.msk.mxu0 %vm4477_vm2, %v2396_v19  ;;  %2069 = vmatprep.subr.msk.mxu1 %vm4478_vm15, %v2396_v19  ;;  %vm4488_vm2 = vcmp.eq.s32.totalorder %v3080_v62, %v2788_v36  ;;  %vm4489_vm15 = vcmp.eq.s32.totalorder %v3097_v63, %v2815_v39 }
  0xc9   : > { %2006 = vmatpush2.msk.msra.mxu0 %vm4479_vm12, %v2396_v19  ;;  %2070 = vmatpush2.msk.msra.mxu1 %vm4480_vm3, %v2396_v19  ;;  %vm4490_vm12 = vcmp.eq.s32.totalorder %v3114_v0, %v2815_v39  ;;  %vm4491_vm3 = vcmp.eq.s32.totalorder %v3097_v63, %v2788_v36 }
  0xca   : > { %2007 = vmatprep.subr.msk.mxu0 %vm4481_vm1, %v2396_v19  ;;  %2071 = vmatprep.subr.msk.mxu1 %vm4482_vm13, %v2396_v19  ;;  %vm4492_vm1 = vcmp.eq.s32.totalorder %v3114_v0, %v2788_v36  ;;  %vm4493_vm13 = vcmp.eq.s32.totalorder %v3131_v2, %v2815_v39 }
  0xcb   : > { %2008 = vmatpush2.msk.msra.mxu0 %vm4483_vm8, %v2396_v19  ;;  %2072 = vmatpush2.msk.msra.mxu1 %vm4484_vm6, %v2396_v19  ;;  %vm4494_vm8 = vcmp.eq.s32.totalorder %v3148_v3, %v2815_v39  ;;  %vm4495_vm6 = vcmp.eq.s32.totalorder %v3131_v2, %v2788_v36 }
  0xcc   : > { %2009 = vmatprep.subr.msk.mxu0 %vm4485_vm0, %v2396_v19  ;;  %2073 = vmatprep.subr.msk.mxu1 %vm4486_vm5, %v2396_v19  ;;  %vm4496_vm0 = vcmp.eq.s32.totalorder %v3148_v3, %v2788_v36  ;;  %vm4497_vm5 = vcmp.eq.s32.totalorder %v3165_v4, %v2815_v39 }
  0xcd   : > { %2010 = vmatpush2.msk.msra.mxu0 %vm4487_vm10, %v2396_v19  ;;  %2074 = vmatpush2.msk.msra.mxu1 %vm4488_vm2, %v2396_v19  ;;  %vm4498_vm10 = vcmp.eq.s32.totalorder %v3182_v5, %v2815_v39  ;;  %vm4499_vm2 = vcmp.eq.s32.totalorder %v3165_v4, %v2788_v36 }
  0xce   : > { %2011 = vmatprep.subr.msk.mxu0 %vm4489_vm15, %v2396_v19  ;;  %2075 = vmatprep.subr.msk.mxu1 %vm4490_vm12, %v2396_v19  ;;  %vm4500_vm15 = vcmp.eq.s32.totalorder %v3182_v5, %v2788_v36  ;;  %vm4501_vm12 = vcmp.eq.s32.totalorder %v3199_v6, %v2815_v39 }
  0xcf   : > { %2012 = vmatpush2.msk.msra.mxu0 %vm4491_vm3, %v2396_v19  ;;  %2076 = vmatpush2.msk.msra.mxu1 %vm4492_vm1, %v2396_v19  ;;  %vm4502_vm3 = vcmp.eq.s32.totalorder %v3216_v9, %v2815_v39  ;;  %vm4503_vm1 = vcmp.eq.s32.totalorder %v3199_v6, %v2788_v36 }
  0xd0   : > { %2013 = vmatprep.subr.msk.mxu0 %vm4493_vm13, %v2396_v19  ;;  %2077 = vmatprep.subr.msk.mxu1 %vm4494_vm8, %v2396_v19  ;;  %vm4504_vm13 = vcmp.eq.s32.totalorder %v3216_v9, %v2788_v36  ;;  %vm4505_vm8 = vcmp.eq.s32.totalorder %v3231_v10, %v2815_v39 }
  0xd1   : > { %2014 = vmatpush2.msk.msra.mxu0 %vm4495_vm6, %v2396_v19  ;;  %2078 = vmatpush2.msk.msra.mxu1 %vm4496_vm0, %v2396_v19  ;;  %vm4506_vm6 = vcmp.eq.s32.totalorder %v3248_v30, %v2815_v39  ;;  %vm4507_vm0 = vcmp.eq.s32.totalorder %v3231_v10, %v2788_v36 }
  0xd2   : > { %2015 = vmatprep.subr.msk.mxu0 %vm4497_vm5, %v2396_v19  ;;  %2079 = vmatprep.subr.msk.mxu1 %vm4498_vm10, %v2396_v19  ;;  %vm4508_vm5 = vcmp.eq.s32.totalorder %v3248_v30, %v2788_v36  ;;  %vm4509_vm10 = vcmp.eq.s32.totalorder %v3265_v33, %v2815_v39 }
  0xd3   : > { %2016 = vmatpush2.msk.msra.mxu0 %vm4499_vm2, %v2396_v19  ;;  %2080 = vmatpush2.msk.msra.mxu1 %vm4500_vm15, %v2396_v19  ;;  %vm4510_vm2 = vcmp.eq.s32.totalorder %v3286_v56, %v2815_v39  ;;  %vm4511_vm15 = vcmp.eq.s32.totalorder %v3286_v56, %v2788_v36 }
  0xd4   : > { %2017 = vmatprep.subr.msk.mxu0 %vm4501_vm12, %v2396_v19  ;;  %2081 = vmatprep.subr.msk.mxu1 %vm4502_vm3, %v2396_v19  ;;  %vm4512_vm12 = vcmp.eq.s32.totalorder %v3307_v58, %v2815_v39  ;;  %vm4513_vm3 = vcmp.eq.s32.totalorder %v3328_v57, %v2815_v39 }
  0xd5   : > { %2018 = vmatpush2.msk.msra.mxu0 %vm4503_vm1, %v2396_v19  ;;  %2082 = vmatpush2.msk.msra.mxu1 %vm4504_vm13, %v2396_v19 }
  0xd6   : > { %2019 = vmatprep.subr.msk.mxu0 %vm4505_vm8, %v2396_v19  ;;  %2083 = vmatprep.subr.msk.mxu1 %vm4506_vm6, %v2396_v19 }
  0xd7   : > { %2020 = vmatpush2.msk.msra.mxu0 %vm4507_vm0, %v2396_v19  ;;  %2084 = vmatpush2.msk.msra.mxu1 %vm4508_vm5, %v2396_v19 }
  0xd8   : > { %2021 = vmatprep.subr.msk.mxu0 %vm4509_vm10, %v2396_v19  ;;  %2085 = vmatprep.subr.msk.mxu1 %vm4510_vm2, %v2396_v19 }
  0xd9   : > { %2022 = vmatpush2.msk.msra.mxu0 %vm402_vm9, %v2396_v19  ;;  %2086 = vmatpush2.msk.msra.mxu1 %vm4511_vm15, %v2396_v19  ;;  %vm4514_vm9 = vcmp.eq.s32.totalorder %v3328_v57, %v2788_v36 }
  0xda   : > { %2023 = vmatprep.subr.msk.mxu0 %vm4512_vm12, %v2396_v19  ;;  %2087 = vmatprep.subr.msk.mxu1 %vm4513_vm3, %v2396_v19 }
  0xdb   : > { %2024 = vmatpush2.msk.msra.mxu0 %vm398_vm11, %v2396_v19  ;;  %2088 = vmatpush2.msk.msra.mxu1 %vm4514_vm9, %v2396_v19  ;;  %vm4515_vm11 = vcmp.eq.s32.totalorder %v3370_v18, %v2788_v36 }
  0xdc   : > { %2025 = vmatprep.subr.msk.mxu0 %vm395_vm7, %v2396_v19  ;;  %2089 = vmatprep.subr.msk.mxu1 %vm523_vm14, %v2396_v19 }
  0xdd   : > { %2026 = vmatpush2.msk.msra.mxu0 %vm394_vm4, %v2396_v19  ;;  %1306 = vmatprep.mubr.f32.mxu0 %v2210_v16 }
  0xde   : > { %2090 = vmatpush2.msk.msra.mxu1 %vm4515_vm11, %v2396_v19  ;;  %1377 = vmatprep.mubr.f32.mxu1 %v2211_v17 }
  0xdf   : > { %1307 = vmatmul.mubr.f32.vlgmr.msra.gmra.mxu0 %v3589_v1  ;;  %1378 = vmatmul.mubr.f32.vlgmr.msra.gmra.mxu1 %v3592_v43 }
 0x15d   : > { %v1166_v20 = vpop.f32.mrf.mxu0  ;;  %v1237_v21 = vpop.f32.mrf.mxu1 }
 0x15e   : > { %v1238_v22 = vadd.f32 %v1237_v21, %v1166_v20 }
 0x15f   : > { %v1168_v23 = vpop.f32.mrf.mxu0  ;;  %v1239_v24 = vpop.f32.mrf.mxu1 }
 0x160   : > { %v1240_v25 = vadd.f32 %v1239_v24, %v1168_v23 }
 0x19e   : > { %1387 = sbr.rel (%p2091_p6) target bundleno = 421 (0x1a5), region = 40 }
 0x19f   : > { %v1308_v26 = vpop.f32.mrf.mxu0  ;;  %v1379_v27 = vpop.f32.mrf.mxu1 }
 0x1a0   : > { %v1380_v28 = vadd.f32 %v1379_v27, %v1308_v26 }
 0x1a1   : > { %v1310_v29 = vpop.f32.mrf.mxu0  ;;  %v1381_v31 = vpop.f32.mrf.mxu1 }
 0x1a2   : > { %v1382_v18 = vadd.f32 %v1381_v31, %v1310_v29 }
 0x1a3   : > { %1388 = vst [vmem:[#allocation2 + $0x10] sm:$0xff] %v1238_v22  ;;  %1389 = vst [vmem:[#allocation2] sm:$0xff] %v1240_v25 }
 0x1a4   : > { %1390 = vst [vmem:[#allocation2 + $0x18] sm:$0xff] %v1380_v28  ;;  %1391 = vst [vmem:[#allocation2 + $0x8] sm:$0xff] %v1382_v18 }
 0x1a5 PF: > { %p2092_p8 = scmp.eq.s32.totalorder %s2376_s15, 0 }
 0x1a7   : > { %1395 = sbr.rel (%p2092_p8) target bundleno = 433 (0x1b1), region = 44 }
 0x1ac   : > { %v1396_v1 = vld [vmem:[#allocation2 + $0x10] sm:$0xff]  ;;  %v1397_v19 = vld [vmem:[#allocation2] sm:$0xff]  ;;  %v1398_v32 = vld [vmem:[#allocation2 + $0x18] sm:$0xff] }
 0x1ad   : > { %v1400_v34 = vadd.f32 %v1396_v1, %v1238_v22  ;;  %v1401_v35 = vadd.f32 %v1397_v19, %v1240_v25  ;;  %v1402_v36 = vadd.f32 %v1398_v32, %v1380_v28  ;;  %v1399_v37 = vld [vmem:[#allocation2 + $0x8] sm:$0xff] }
 0x1ae   : > { %v1403_v38 = vadd.f32 %v1399_v37, %v1382_v18 }
 0x1af   : > { %1404 = vst [vmem:[#allocation2 + $0x10] sm:$0xff] %v1400_v34  ;;  %1405 = vst [vmem:[#allocation2] sm:$0xff] %v1401_v35 }
 0x1b0   : > { %1406 = vst [vmem:[#allocation2 + $0x18] sm:$0xff] %v1402_v36  ;;  %1407 = vst [vmem:[#allocation2 + $0x8] sm:$0xff] %v1403_v38 }
 0x1b1 PF: > { %p2093_p1 = scmp.ne.s32.totalorder %s2376_s15, 1 }
 0x1b3   : > { %1411 = sbr.rel (%p2093_p1) target bundleno = 443 (0x1bb), region = 48 }
 0x1b8   : > { %v1412_v39 = vld [vmem:[#allocation2 + $0x10] sm:$0xff]  ;;  %v1413_v40 = vld [vmem:[#allocation2] sm:$0xff]  ;;  %v1414_v41 = vld [vmem:[#allocation2 + $0x18] sm:$0xff] }
 0x1b9   : > { %1416 = vst [vmem:[%s4262_s7] sm:$0xff] %v1412_v39  ;;  %1417 = vst [vmem:[%s4262_s7 + $0x8] sm:$0xff] %v1413_v40  ;;  %v1415_v42 = vld [vmem:[#allocation2 + $0x8] sm:$0xff] }
 0x1ba   : > { %1418 = vst [vmem:[%s4262_s7 + $0x10] sm:$0xff] %v1414_v41  ;;  %1419 = vst [vmem:[%s4262_s7 + $0x18] sm:$0xff] %v1415_v42 }
 0x1bb PF: > { %s2101_s4 = sshll.u32 %s2380_s16, 9  ;;  %s1435_s0 = sshll.u32 %s4262_s7, 4  ;;  %s1436_s0 = int_to_ptr.vmem [resolvable:$true] %s1435_s0 }
 0x1bc   : > { %s1433_s3 = scalar_lea.hbm %s4328_s2, %s2101_s4  ;;  %s1421_s21 = scalar_lea.sflag [#allocation5], %s2586_s29 }
 0x1bd   : > { %s2268_s6 = scalar_lea.vmem %s1436_s0, 512  ;;  %p4516_p5 = scmp.ne.s32.totalorder %s4354_s27, 0 }
 0x1be   : > { %p2269_p12 = scmp.ne.s32.totalorder %s1436_s0, %s2268_s6  ;;  %s2397_s9 = smov [#allocation8]  }
 0x1bf   : > { %s2272_s30 = sshll.u32 %s2397_s9, 4  ;;  %s2273_s30 = int_to_ptr.vmem [resolvable:$false] %s2272_s30 }
 0x1c0   : > { %p2270_p3 = pnand %p2269_p12, %p4516_p5  ;;  %s2274_s12 = scalar_lea.vmem %s2273_s30, 1024 }
 0x1c1   : > { %p2275_p9 = scmp.lt.s32.totalorder %s1436_s0, %s2273_s30  ;;  %p2276_p10 = scmp.lt.s32.totalorder %s2274_s12, %s2268_s6 }
 0x1c2   : > { %p2271_p4 = pneg %p2270_p3 }
 0x1c3   : > { %p2277_p0 = por %p2276_p10, %p2275_p9 }
 0x1c5   : > { %p2278_p11 = pnand %p2277_p0, %p2271_p4 }
 0x1c7   : > { %2281 = shalt.err (!%p2278_p11)
}
 0x1c8   : > { %s2282_s16 = scalar_lea.hbm %s1433_s3, 512  ;;  %s2286_s23 = scalar_lea.hbm %s4328_s2, 1024 }
 0x1c9   : > { %p2283_p13 = scmp.ne.s32.totalorder %s1433_s3, %s2282_s16  ;;  %p2287_p6 = scmp.lt.s32.totalorder %s1433_s3, %s4328_s2 }
 0x1ca   : > { %p2288_p8 = scmp.lt.s32.totalorder %s2286_s23, %s2282_s16 }
 0x1cb   : > { %p2284_p2 = pnand %p2283_p13, %p4516_p5 }
 0x1cc   : > { %p2289_p1 = por %p2288_p8, %p2287_p6 }
 0x1cd   : > { %p2285_p7 = pneg %p2284_p2 }
 0x1cf   : > { %p2290_p12 = pnand %p2289_p1, %p2285_p7 }
 0x1d1   : > { %2293 = shalt.err (!%p2290_p12)
}
 0x1d2   : > { %2106 = dma.vmem_to_hbm [thread:$0]  (%p4516_p5), %s1436_s0, 512, %s1433_s3, %s1421_s21  }
 0x1d3 PF: > { %s4517_s26 = sld [smem:[#allocation12_spill]]  ;;  %p2120_p3 = scmp.ge.s32.totalorder %s2392_s19, 2 }
 0x1d4   : > { %s4518_s7 = sld [smem:[#allocation13_spill]] }
 0x1d9   : > { %s1447_s4 = sand.u32 1, %s4517_s26  }
 0x1da   : > { %p4519_p4 = scmp.ne.s32.totalorder %s4518_s7, 0  ;;  %s1448_s15 = scalar_lea.sflag [#allocation5], %s1447_s4 }
 0x1dc   : > { %p2116_p9 = pnand %p2120_p3, %p4519_p4 }
 0x1de   : > { %p2117_p10 = pneg %p2116_p9 }
 0x1e0   : > { %2347 = dma.done.wait (%p2117_p10), %s1448_s15, 512  }
 0x1e1   : > { %2349 = vsyncadd (%p2117_p10), %s1448_s15, 4294966784  ;;  %s21_s19 = sadd.s32 1, %s2392_s19   ;;  %s4520_s27 = sld [smem:[#allocation14_spill]] }
 0x1e2   : > { %p18_p0 = scmp.ge.s32.totalorder %s21_s19, 6   ;;  %s4521_s9 = smov %s2356_s10 }
 0x1e3   : > { %s4522_s10 = smov %s2360_s11  ;;  %s4523_s11 = smov %s2558_s8 }
 0x1e4   : > { %s4524_s12 = smov %s2368_s13  ;;  %s4525_s13 = smov %s2372_s14 }
 0x1e5   : > { %s4526_s14 = smov %s2566_s25  ;;  %s4527_s15 = smov %s2384_s17 }
 0x1e6   : > { %s4528_s16 = smov %s2388_s18  ;;  %s4530_s18 = smov %s4536_s22 }
 0x1e7   : > { %s4529_s17 = smov %s4520_s27  ;;  %20 = sbr.rel (!%p18_p0) target bundleno = 13 (0xd), region = 98 }
 0x1ec   :  { %1453 = vsyncpa [#allocation4], 1 }
 0x1ed   :  { %1455 = vsyncpa [#allocation4 + $0x1], 1 }
 0x1ee   :  { %1456 = vsyncpa [#allocation7], 1 }
 0x1ef   :  { %1458 = vsyncpa [#allocation7 + $0x1], 1 }
 0x1f0   :  { %1459 = vsyncpa [#allocation5], 1 }
 0x1f1   :  { %1461 = vsyncpa [#allocation5 + $0x1], 1 }

</bundles_post_ra>
